<compile_context>
chip_gen: v7x
topology: tpu7x:2x2x1
jax: 0.10.0
libtpu: 0.0.40
codegen_flags: <defaults>
</compile_context>

<pallas_src>
import jax
import jax.numpy as jnp
from jax.experimental import pallas as pl
from jax.experimental.pallas import tpu as pltpu

LRELU_SLOPE = 0.2
BN_EPS = 1e-5


# ----------------------------- kernel helpers ------------------------------

def _leaky_relu(x):
    return jnp.where(x >= 0.0, x, LRELU_SLOPE * x)


def _batch_stats(acc):
    # Single fused lane reduction over the stacked [acc; acc*acc] block
    # (training-mode BatchNorm statistics, biased variance, f32).
    c = acc.shape[0]
    inv_m = 1.0 / acc.shape[1]
    stacked = jnp.concatenate([acc, acc * acc], axis=0)        # (2C, M)
    sums = jnp.sum(stacked, axis=1, keepdims=True) * inv_m      # (2C, 1)
    mean = sums[:c]
    var = jnp.maximum(sums[c:] - mean * mean, 0.0)
    return mean, var


# ----------------------------- Pallas kernels ------------------------------

def _conv_lrelu_kernel(w_ref, p_ref, o_ref):
    # w_ref: (Cout, K) bf16, p_ref: (K, TM) bf16 -> o_ref: (Cout, TM) bf16
    acc = jnp.dot(w_ref[...], p_ref[...], preferred_element_type=jnp.float32)
    o_ref[...] = _leaky_relu(acc).astype(o_ref.dtype)


def _conv_bn_lrelu_kernel(w_ref, p_ref, g_ref, b_ref, o_ref):
    # Conv (matmul) + BatchNorm2d (batch stats over N*H*W) + LeakyReLU(0.2).
    acc = jnp.dot(w_ref[...], p_ref[...], preferred_element_type=jnp.float32)
    mean, var = _batch_stats(acc)
    scale = g_ref[...] * jax.lax.rsqrt(var + BN_EPS)
    shift = b_ref[...] - mean * scale
    o_ref[...] = _leaky_relu(acc * scale + shift).astype(o_ref.dtype)


def _conv_bn_lrelu_head_kernel(w4_ref, p4_ref, g_ref, b_ref, w5_ref, o_ref):
    # Layer 4 (conv + BN + LeakyReLU) fused with layer 5 (4x4 valid conv over
    # the 4x4 map -> 1 logit -> sigmoid).
    acc = jnp.dot(w4_ref[...], p4_ref[...], preferred_element_type=jnp.float32)
    mean, var = _batch_stats(acc)
    scale = g_ref[...] * jax.lax.rsqrt(var + BN_EPS)
    shift = b_ref[...] - mean * scale
    y = _leaky_relu(acc * scale + shift)                        # (C4, 16*N) f32

    # Layer 5: out[n] = sum_{c,s} y[c, 16n+s] * w5[c, s].  Tile w5 along lanes
    # in-kernel and pool each batch's 16 spatial lanes with an iota-built
    # bf16 selection matrix (MXU), then reduce over channels (sublanes).
    n = o_ref.shape[1]
    w5_t = jnp.tile(w5_ref[...], (1, n))                        # (C4, 16*N) f32
    prod = (y * w5_t).astype(jnp.bfloat16)
    r = jax.lax.broadcasted_iota(jnp.int32, (16 * n, n), 0)
    c = jax.lax.broadcasted_iota(jnp.int32, (16 * n, n), 1)
    pool = jnp.where((r >= 16 * c) & (r < 16 * c + 16),
                     1.0, 0.0).astype(jnp.bfloat16)             # (16N, N)
    pooled = jnp.dot(prod, pool, preferred_element_type=jnp.float32)  # (C4, N)
    scores = jnp.sum(pooled, axis=0, keepdims=True)             # (1, N)
    o_ref[...] = jax.nn.sigmoid(scores)


# --------------------------- pallas_call wrappers ---------------------------

def _pick_tile_m(m, limit=4096):
    if m <= limit:
        return m
    for t in (4096, 2048, 1024, 512, 256, 128):
        if m % t == 0:
            return t
    return m


def _conv_lrelu(w_t, p_t):
    cout, k = w_t.shape
    m = p_t.shape[1]
    tm = _pick_tile_m(m)
    return pl.pallas_call(
        _conv_lrelu_kernel,
        out_shape=jax.ShapeDtypeStruct((cout, m), jnp.bfloat16),
        grid=(m // tm,),
        in_specs=[pl.BlockSpec((cout, k), lambda i: (0, 0)),
                  pl.BlockSpec((k, tm), lambda i: (0, i))],
        out_specs=pl.BlockSpec((cout, tm), lambda i: (0, i)),
        compiler_params=pltpu.CompilerParams(
            dimension_semantics=("parallel",)),
    )(w_t, p_t)


def _conv_bn_lrelu(w_t, p_t, g, b):
    cout, k = w_t.shape
    m = p_t.shape[1]
    # Batch statistics need every M column inside one block -> tile over Cout.
    ct = 128 if cout % 128 == 0 else cout
    # Rough VMEM footprint: double-buffered bf16 patch block + f32 conv/stat
    # working set + bf16 output block.  Raise the scoped limit if it gets big.
    resident_bytes = 2 * (k * m * 2) + 3 * (ct * m * 4) + 2 * (ct * m * 2)
    extra = {}
    if resident_bytes > 24 * 1024 * 1024:
        extra["vmem_limit_bytes"] = min(2 * resident_bytes, 128 * 1024 * 1024)
    return pl.pallas_call(
        _conv_bn_lrelu_kernel,
        out_shape=jax.ShapeDtypeStruct((cout, m), jnp.bfloat16),
        grid=(cout // ct,),
        in_specs=[pl.BlockSpec((ct, k), lambda i: (i, 0)),
                  pl.BlockSpec((k, m), lambda i: (0, 0)),
                  pl.BlockSpec((ct, 1), lambda i: (i, 0)),
                  pl.BlockSpec((ct, 1), lambda i: (i, 0))],
        out_specs=pl.BlockSpec((ct, m), lambda i: (i, 0)),
        compiler_params=pltpu.CompilerParams(
            dimension_semantics=("parallel",), **extra),
    )(w_t, p_t, g, b)


def _conv_bn_lrelu_head(w4_t, p4_t, g, b, w5):
    n = p4_t.shape[1] // 16
    # Tiny problem: everything fits in VMEM as whole-array blocks.
    return pl.pallas_call(
        _conv_bn_lrelu_head_kernel,
        out_shape=jax.ShapeDtypeStruct((1, n), jnp.float32),
    )(w4_t, p4_t, g, b, w5)


# ------------------------------- JAX glue ----------------------------------

def _im2col_cm(x, kh, kw, stride, pad):
    """x: (C, N, H, W) -> patches (KH*KW*C, N*OH*OW), rows ordered (kh, kw, c)."""
    c, n, h, w = x.shape
    xp = jnp.pad(x, ((0, 0), (0, 0), (pad, pad), (pad, pad)))
    oh = (h + 2 * pad - kh) // stride + 1
    ow = (w + 2 * pad - kw) // stride + 1
    taps = [xp[:, :, i:i + stride * oh:stride, j:j + stride * ow:stride]
            for i in range(kh) for j in range(kw)]
    p = jnp.stack(taps, axis=0).reshape(kh * kw * c, n * oh * ow)
    return p, (n, oh, ow)


def init_params(key, hidden_dim, n_channels):
    hd = hidden_dim
    ks = jax.random.split(key, 8)

    def conv_wt(k, cin, cout):
        # PyTorch weights_init: normal(0, 0.02).  Stored transposed (Cout, K)
        # with K ordered (kh, kw, cin) to match the im2col rows, bf16 for MXU.
        w = 0.02 * jax.random.normal(k, (4, 4, cin, cout), jnp.float32)
        return w.reshape(16 * cin, cout).T.astype(jnp.bfloat16)

    def bn_gamma(k, c):
        # weights_init: normal(1.0, 0.02); stored (C, 1) for the (C, M) layout.
        return 1.0 + 0.02 * jax.random.normal(k, (c, 1), jnp.float32)

    w5 = 0.02 * jax.random.normal(ks[7], (4, 4, 8 * hd), jnp.float32)
    params = {
        "w1": conv_wt(ks[0], n_channels, hd),
        "w2": conv_wt(ks[1], hd, 2 * hd),
        "g2": bn_gamma(ks[2], 2 * hd),
        "b2": jnp.zeros((2 * hd, 1), jnp.float32),
        "w3": conv_wt(ks[3], 2 * hd, 4 * hd),
        "g3": bn_gamma(ks[4], 4 * hd),
        "b3": jnp.zeros((4 * hd, 1), jnp.float32),
        "w4": conv_wt(ks[5], 4 * hd, 8 * hd),
        "g4": bn_gamma(ks[6], 8 * hd),
        "b4": jnp.zeros((8 * hd, 1), jnp.float32),
        # Layer 5 weight as (C4, 16): column s = 4*kh + kw, f32 (epilogue).
        "w5": w5.reshape(16, 8 * hd).T,
    }
    return params


@jax.jit
def discriminator_forward(params, x_nchw):
    """x_nchw: (N, C, 64, 64) float -> (N, 1, 1, 1) sigmoid scores."""
    # NCHW -> channel-major (C, N, H, W), bf16 so all im2col glue is half-width.
    x = jnp.transpose(x_nchw, (1, 0, 2, 3)).astype(jnp.bfloat16)

    # Layer 1: Conv(4,2,1) + LeakyReLU(0.2), M-tiled "parallel" grid.
    p, (n, oh, ow) = _im2col_cm(x, 4, 4, 2, 1)
    y = _conv_lrelu(params["w1"], p)                     # (hd, M) bf16
    x = y.reshape(-1, n, oh, ow)

    # Layers 2-3: Conv(4,2,1) + BatchNorm2d (batch stats) + LeakyReLU(0.2).
    for wk, gk, bk in (("w2", "g2", "b2"), ("w3", "g3", "b3")):
        p, (n, oh, ow) = _im2col_cm(x, 4, 4, 2, 1)
        y = _conv_bn_lrelu(params[wk], p, params[gk], params[bk])
        x = y.reshape(-1, n, oh, ow)

    # Layer 4 (Conv+BN+LReLU) fused with layer 5 (Conv(4,1,0) + Sigmoid).
    p, _ = _im2col_cm(x, 4, 4, 2, 1)                     # spatial 4x4
    scores = _conv_bn_lrelu_head(params["w4"], p, params["g4"], params["b4"],
                                 params["w5"])           # (1, N)
    return scores.reshape(-1, 1, 1, 1)                   # NCHW: (N, 1, 1, 1)


if __name__ == "__main__":
    hidden_dim = 8
    n_channels = 3
    batch = 2

    key = jax.random.PRNGKey(0)
    k_param, k_input = jax.random.split(key)
    params = init_params(k_param, hidden_dim, n_channels)
    # DCGAN discriminator geometry requires 64x64 spatial input.
    x = jax.random.normal(k_input, (batch, n_channels, 64, 64), jnp.float32)

    out = jax.block_until_ready(discriminator_forward(params, x))
    assert out.shape == (batch, 1, 1, 1)
    assert bool(jnp.all((out > 0.0) & (out < 1.0)))
    print("KERNEL_OK")
</pallas_src>

<mosaic_0001>
module attributes {stable_mosaic.version = 11 : i64} {
  func.func @_conv_lrelu_kernel(%arg0: i32, %arg1: memref<8x48xbf16, #tpu.memory_space<vmem>>, %arg2: memref<48x2048xbf16, #tpu.memory_space<vmem>>, %arg3: memref<8x2048xbf16, #tpu.memory_space<vmem>>) attributes {dimension_semantics = [#tpu.dimension_semantics<parallel>], iteration_bounds = array<i64: 1>, scalar_prefetch = 0 : i64, scratch_operands = 0 : i64, tpu.core_type = #tpu.core_type<tc>, window_params = [{pipeline_mode = #tpu.pipeline_mode<synchronous>, transform_indices = @transform_0, window_bounds = array<i64: 8, 48>}, {transform_indices = @transform_1, window_bounds = array<i64: 48, 2048>}, {transform_indices = @transform_2, window_bounds = array<i64: 8, 2048>}]} {
    %c0 = arith.constant 0 : index
    %c0_0 = arith.constant 0 : index
    %0 = vector.load %arg1[%c0, %c0_0] : memref<8x48xbf16, #tpu.memory_space<vmem>>, vector<8x48xbf16>
    %c0_1 = arith.constant 0 : index
    %c0_2 = arith.constant 0 : index
    %1 = vector.load %arg2[%c0_1, %c0_2] : memref<48x2048xbf16, #tpu.memory_space<vmem>>, vector<48x2048xbf16>
    %cst = arith.constant dense<0.000000e+00> : vector<8x2048xf32>
    %2 = tpu.matmul %0, %1, %cst {dimension_numbers = #tpu.dot_dimension_numbers<[1], [0], [0], [1], [0, 0, 1, 1], [], []>} : vector<8x48xbf16>, vector<48x2048xbf16>, vector<8x2048xf32> -> vector<8x2048xf32>
    %cst_3 = arith.constant 0.000000e+00 : f32
    %3 = vector.broadcast %cst_3 : f32 to vector<8x2048xf32>
    %4 = arith.cmpf oge, %2, %3 : vector<8x2048xf32>
    %cst_4 = arith.constant 2.000000e-01 : f32
    %5 = vector.broadcast %cst_4 : f32 to vector<8x2048xf32>
    %6 = arith.mulf %5, %2 : vector<8x2048xf32>
    %7 = arith.select %4, %2, %6 : vector<8x2048xi1>, vector<8x2048xf32>
    %8 = arith.truncf %7 : vector<8x2048xf32> to vector<8x2048xbf16>
    %c0_5 = arith.constant 0 : index
    %c0_6 = arith.constant 0 : index
    %9 = vector.load %arg3[%c0_5, %c0_6] : memref<8x2048xbf16, #tpu.memory_space<vmem>>, vector<8x2048xbf16>
    tpu.vector_store %arg3[%c0_5, %c0_6], %8 {strides = array<i32>} : memref<8x2048xbf16, #tpu.memory_space<vmem>>, vector<8x2048xbf16>,
    return
  }
  func.func @transform_0(%arg0: i32) -> (i32, i32) {
    %c0_i32 = arith.constant 0 : i32
    %c0_i32_0 = arith.constant 0 : i32
    %c0_i32_1 = arith.constant 0 : i32
    return %c0_i32, %c0_i32_0 : i32, i32
  }
  func.func @transform_1(%arg0: i32) -> (i32, i32) {
    %c0_i32 = arith.constant 0 : i32
    %c0_i32_0 = arith.constant 0 : i32
    return %c0_i32, %arg0 : i32, i32
  }
  func.func @transform_2(%arg0: i32) -> (i32, i32) {
    %c0_i32 = arith.constant 0 : i32
    %c0_i32_0 = arith.constant 0 : i32
    return %c0_i32, %arg0 : i32, i32
  }
}

module attributes {stable_mosaic.version = 11 : i64} {
  func.func @_conv_bn_lrelu_kernel(%arg0: i32, %arg1: memref<16x128xbf16, #tpu.memory_space<vmem>>, %arg2: memref<128x512xbf16, #tpu.memory_space<vmem>>, %arg3: memref<16x1xf32, #tpu.memory_space<vmem>>, %arg4: memref<16x1xf32, #tpu.memory_space<vmem>>, %arg5: memref<16x512xbf16, #tpu.memory_space<vmem>>) attributes {dimension_semantics = [#tpu.dimension_semantics<parallel>], iteration_bounds = array<i64: 1>, scalar_prefetch = 0 : i64, scratch_operands = 0 : i64, tpu.core_type = #tpu.core_type<tc>, window_params = [{transform_indices = @transform_0, window_bounds = array<i64: 16, 128>}, {pipeline_mode = #tpu.pipeline_mode<synchronous>, transform_indices = @transform_1, window_bounds = array<i64: 128, 512>}, {transform_indices = @transform_2, window_bounds = array<i64: 16, 1>}, {transform_indices = @transform_3, window_bounds = array<i64: 16, 1>}, {transform_indices = @transform_4, window_bounds = array<i64: 16, 512>}]} {
    %c0 = arith.constant 0 : index
    %c0_0 = arith.constant 0 : index
    %0 = vector.load %arg1[%c0, %c0_0] : memref<16x128xbf16, #tpu.memory_space<vmem>>, vector<16x128xbf16>
    %c0_1 = arith.constant 0 : index
    %c0_2 = arith.constant 0 : index
    %1 = vector.load %arg2[%c0_1, %c0_2] : memref<128x512xbf16, #tpu.memory_space<vmem>>, vector<128x512xbf16>
    %cst = arith.constant dense<0.000000e+00> : vector<16x512xf32>
    %2 = tpu.matmul %0, %1, %cst {dimension_numbers = #tpu.dot_dimension_numbers<[1], [0], [0], [1], [0, 0, 1, 1], [], []>} : vector<16x128xbf16>, vector<128x512xbf16>, vector<16x512xf32> -> vector<16x512xf32>
    %3 = arith.mulf %2, %2 : vector<16x512xf32>
    %4 = tpu.concatenate %2, %3 in 0 : vector<16x512xf32>, vector<16x512xf32> -> vector<32x512xf32>
    %cst_3 = arith.constant dense<0.000000e+00> : vector<32xf32>
    %5 = vector.multi_reduction <add>, %4, %cst_3 [1] : vector<32x512xf32> to vector<32xf32>
    %6 = vector.shape_cast %5 : vector<32xf32> to vector<32x1xf32>
    %cst_4 = arith.constant 0.001953125 : f32
    %7 = vector.broadcast %cst_4 : f32 to vector<32x1xf32>
    %8 = arith.mulf %6, %7 : vector<32x1xf32>
    %9 = vector.extract_strided_slice %8 {offsets = [0, 0], sizes = [16, 1], strides = [1, 1]} : vector<32x1xf32> to vector<16x1xf32>
    %10 = vector.extract_strided_slice %8 {offsets = [16, 0], sizes = [16, 1], strides = [1, 1]} : vector<32x1xf32> to vector<16x1xf32>
    %11 = arith.mulf %9, %9 : vector<16x1xf32>
    %12 = arith.subf %10, %11 : vector<16x1xf32>
    %cst_5 = arith.constant 0.000000e+00 : f32
    %13 = vector.broadcast %cst_5 : f32 to vector<16x1xf32>
    %14 = arith.maximumf %12, %13 : vector<16x1xf32>
    %c0_6 = arith.constant 0 : index
    %c0_7 = arith.constant 0 : index
    %15 = vector.load %arg3[%c0_6, %c0_7] : memref<16x1xf32, #tpu.memory_space<vmem>>, vector<16x1xf32>
    %cst_8 = arith.constant 9.99999974E-6 : f32
    %16 = vector.broadcast %cst_8 : f32 to vector<16x1xf32>
    %17 = arith.addf %14, %16 : vector<16x1xf32>
    %18 = math.rsqrt %17 : vector<16x1xf32>
    %19 = arith.mulf %15, %18 : vector<16x1xf32>
    %c0_9 = arith.constant 0 : index
    %c0_10 = arith.constant 0 : index
    %20 = vector.load %arg4[%c0_9, %c0_10] : memref<16x1xf32, #tpu.memory_space<vmem>>, vector<16x1xf32>
    %21 = arith.mulf %9, %19 : vector<16x1xf32>
    %22 = arith.subf %20, %21 : vector<16x1xf32>
    %23 = vector.broadcast %19 : vector<16x1xf32> to vector<16x512xf32>
    %24 = arith.mulf %2, %23 : vector<16x512xf32>
    %25 = vector.broadcast %22 : vector<16x1xf32> to vector<16x512xf32>
    %26 = arith.addf %24, %25 : vector<16x512xf32>
    %cst_11 = arith.constant 0.000000e+00 : f32
    %27 = vector.broadcast %cst_11 : f32 to vector<16x512xf32>
    %28 = arith.cmpf oge, %26, %27 : vector<16x512xf32>
    %cst_12 = arith.constant 2.000000e-01 : f32
    %29 = vector.broadcast %cst_12 : f32 to vector<16x512xf32>
    %30 = arith.mulf %29, %26 : vector<16x512xf32>
    %31 = arith.select %28, %26, %30 : vector<16x512xi1>, vector<16x512xf32>
    %32 = arith.truncf %31 : vector<16x512xf32> to vector<16x512xbf16>
    %c0_13 = arith.constant 0 : index
    %c0_14 = arith.constant 0 : index
    %33 = vector.load %arg5[%c0_13, %c0_14] : memref<16x512xbf16, #tpu.memory_space<vmem>>, vector<16x512xbf16>
    tpu.vector_store %arg5[%c0_13, %c0_14], %32 {strides = array<i32>} : memref<16x512xbf16, #tpu.memory_space<vmem>>, vector<16x512xbf16>,
    return
  }
  func.func @transform_0(%arg0: i32) -> (i32, i32) {
    %c0_i32 = arith.constant 0 : i32
    %c0_i32_0 = arith.constant 0 : i32
    return %arg0, %c0_i32 : i32, i32
  }
  func.func @transform_1(%arg0: i32) -> (i32, i32) {
    %c0_i32 = arith.constant 0 : i32
    %c0_i32_0 = arith.constant 0 : i32
    %c0_i32_1 = arith.constant 0 : i32
    return %c0_i32, %c0_i32_0 : i32, i32
  }
  func.func @transform_2(%arg0: i32) -> (i32, i32) {
    %c0_i32 = arith.constant 0 : i32
    %c0_i32_0 = arith.constant 0 : i32
    return %arg0, %c0_i32 : i32, i32
  }
  func.func @transform_3(%arg0: i32) -> (i32, i32) {
    %c0_i32 = arith.constant 0 : i32
    %c0_i32_0 = arith.constant 0 : i32
    return %arg0, %c0_i32 : i32, i32
  }
  func.func @transform_4(%arg0: i32) -> (i32, i32) {
    %c0_i32 = arith.constant 0 : i32
    %c0_i32_0 = arith.constant 0 : i32
    return %arg0, %c0_i32 : i32, i32
  }
}

module attributes {stable_mosaic.version = 11 : i64} {
  func.func @_conv_bn_lrelu_kernel(%arg0: i32, %arg1: memref<32x256xbf16, #tpu.memory_space<vmem>>, %arg2: memref<256x128xbf16, #tpu.memory_space<vmem>>, %arg3: memref<32x1xf32, #tpu.memory_space<vmem>>, %arg4: memref<32x1xf32, #tpu.memory_space<vmem>>, %arg5: memref<32x128xbf16, #tpu.memory_space<vmem>>) attributes {dimension_semantics = [#tpu.dimension_semantics<parallel>], iteration_bounds = array<i64: 1>, scalar_prefetch = 0 : i64, scratch_operands = 0 : i64, tpu.core_type = #tpu.core_type<tc>, window_params = [{transform_indices = @transform_0, window_bounds = array<i64: 32, 256>}, {pipeline_mode = #tpu.pipeline_mode<synchronous>, transform_indices = @transform_1, window_bounds = array<i64: 256, 128>}, {transform_indices = @transform_2, window_bounds = array<i64: 32, 1>}, {transform_indices = @transform_3, window_bounds = array<i64: 32, 1>}, {transform_indices = @transform_4, window_bounds = array<i64: 32, 128>}]} {
    %c0 = arith.constant 0 : index
    %c0_0 = arith.constant 0 : index
    %0 = vector.load %arg1[%c0, %c0_0] : memref<32x256xbf16, #tpu.memory_space<vmem>>, vector<32x256xbf16>
    %c0_1 = arith.constant 0 : index
    %c0_2 = arith.constant 0 : index
    %1 = vector.load %arg2[%c0_1, %c0_2] : memref<256x128xbf16, #tpu.memory_space<vmem>>, vector<256x128xbf16>
    %cst = arith.constant dense<0.000000e+00> : vector<32x128xf32>
    %2 = tpu.matmul %0, %1, %cst {dimension_numbers = #tpu.dot_dimension_numbers<[1], [0], [0], [1], [0, 0, 1, 1], [], []>} : vector<32x256xbf16>, vector<256x128xbf16>, vector<32x128xf32> -> vector<32x128xf32>
    %3 = arith.mulf %2, %2 : vector<32x128xf32>
    %4 = tpu.concatenate %2, %3 in 0 : vector<32x128xf32>, vector<32x128xf32> -> vector<64x128xf32>
    %cst_3 = arith.constant dense<0.000000e+00> : vector<64xf32>
    %5 = vector.multi_reduction <add>, %4, %cst_3 [1] : vector<64x128xf32> to vector<64xf32>
    %6 = vector.shape_cast %5 : vector<64xf32> to vector<64x1xf32>
    %cst_4 = arith.constant 7.812500e-03 : f32
    %7 = vector.broadcast %cst_4 : f32 to vector<64x1xf32>
    %8 = arith.mulf %6, %7 : vector<64x1xf32>
    %9 = vector.extract_strided_slice %8 {offsets = [0, 0], sizes = [32, 1], strides = [1, 1]} : vector<64x1xf32> to vector<32x1xf32>
    %10 = vector.extract_strided_slice %8 {offsets = [32, 0], sizes = [32, 1], strides = [1, 1]} : vector<64x1xf32> to vector<32x1xf32>
    %11 = arith.mulf %9, %9 : vector<32x1xf32>
    %12 = arith.subf %10, %11 : vector<32x1xf32>
    %cst_5 = arith.constant 0.000000e+00 : f32
    %13 = vector.broadcast %cst_5 : f32 to vector<32x1xf32>
    %14 = arith.maximumf %12, %13 : vector<32x1xf32>
    %c0_6 = arith.constant 0 : index
    %c0_7 = arith.constant 0 : index
    %15 = vector.load %arg3[%c0_6, %c0_7] : memref<32x1xf32, #tpu.memory_space<vmem>>, vector<32x1xf32>
    %cst_8 = arith.constant 9.99999974E-6 : f32
    %16 = vector.broadcast %cst_8 : f32 to vector<32x1xf32>
    %17 = arith.addf %14, %16 : vector<32x1xf32>
    %18 = math.rsqrt %17 : vector<32x1xf32>
    %19 = arith.mulf %15, %18 : vector<32x1xf32>
    %c0_9 = arith.constant 0 : index
    %c0_10 = arith.constant 0 : index
    %20 = vector.load %arg4[%c0_9, %c0_10] : memref<32x1xf32, #tpu.memory_space<vmem>>, vector<32x1xf32>
    %21 = arith.mulf %9, %19 : vector<32x1xf32>
    %22 = arith.subf %20, %21 : vector<32x1xf32>
    %23 = vector.broadcast %19 : vector<32x1xf32> to vector<32x128xf32>
    %24 = arith.mulf %2, %23 : vector<32x128xf32>
    %25 = vector.broadcast %22 : vector<32x1xf32> to vector<32x128xf32>
    %26 = arith.addf %24, %25 : vector<32x128xf32>
    %cst_11 = arith.constant 0.000000e+00 : f32
    %27 = vector.broadcast %cst_11 : f32 to vector<32x128xf32>
    %28 = arith.cmpf oge, %26, %27 : vector<32x128xf32>
    %cst_12 = arith.constant 2.000000e-01 : f32
    %29 = vector.broadcast %cst_12 : f32 to vector<32x128xf32>
    %30 = arith.mulf %29, %26 : vector<32x128xf32>
    %31 = arith.select %28, %26, %30 : vector<32x128xi1>, vector<32x128xf32>
    %32 = arith.truncf %31 : vector<32x128xf32> to vector<32x128xbf16>
    %c0_13 = arith.constant 0 : index
    %c0_14 = arith.constant 0 : index
    %33 = vector.load %arg5[%c0_13, %c0_14] : memref<32x128xbf16, #tpu.memory_space<vmem>>, vector<32x128xbf16>
    tpu.vector_store %arg5[%c0_13, %c0_14], %32 {strides = array<i32>} : memref<32x128xbf16, #tpu.memory_space<vmem>>, vector<32x128xbf16>,
    return
  }
  func.func @transform_0(%arg0: i32) -> (i32, i32) {
    %c0_i32 = arith.constant 0 : i32
    %c0_i32_0 = arith.constant 0 : i32
    return %arg0, %c0_i32 : i32, i32
  }
  func.func @transform_1(%arg0: i32) -> (i32, i32) {
    %c0_i32 = arith.constant 0 : i32
    %c0_i32_0 = arith.constant 0 : i32
    %c0_i32_1 = arith.constant 0 : i32
    return %c0_i32, %c0_i32_0 : i32, i32
  }
  func.func @transform_2(%arg0: i32) -> (i32, i32) {
    %c0_i32 = arith.constant 0 : i32
    %c0_i32_0 = arith.constant 0 : i32
    return %arg0, %c0_i32 : i32, i32
  }
  func.func @transform_3(%arg0: i32) -> (i32, i32) {
    %c0_i32 = arith.constant 0 : i32
    %c0_i32_0 = arith.constant 0 : i32
    return %arg0, %c0_i32 : i32, i32
  }
  func.func @transform_4(%arg0: i32) -> (i32, i32) {
    %c0_i32 = arith.constant 0 : i32
    %c0_i32_0 = arith.constant 0 : i32
    return %arg0, %c0_i32 : i32, i32
  }
}

module attributes {stable_mosaic.version = 11 : i64} {
  func.func @_conv_bn_lrelu_head_kernel(%arg0: memref<64x512xbf16, #tpu.memory_space<vmem>>, %arg1: memref<512x32xbf16, #tpu.memory_space<vmem>>, %arg2: memref<64x1xf32, #tpu.memory_space<vmem>>, %arg3: memref<64x1xf32, #tpu.memory_space<vmem>>, %arg4: memref<64x16xf32, #tpu.memory_space<vmem>>, %arg5: memref<1x2xf32, #tpu.memory_space<vmem>>) attributes {dimension_semantics = [], scalar_prefetch = 0 : i64, scratch_operands = 0 : i64, tpu.core_type = #tpu.core_type<tc>} {
    %c0 = arith.constant 0 : index
    %c0_0 = arith.constant 0 : index
    %0 = vector.load %arg0[%c0, %c0_0] : memref<64x512xbf16, #tpu.memory_space<vmem>>, vector<64x512xbf16>
    %c0_1 = arith.constant 0 : index
    %c0_2 = arith.constant 0 : index
    %1 = vector.load %arg1[%c0_1, %c0_2] : memref<512x32xbf16, #tpu.memory_space<vmem>>, vector<512x32xbf16>
    %cst = arith.constant dense<0.000000e+00> : vector<64x32xf32>
    %2 = tpu.matmul %0, %1, %cst {dimension_numbers = #tpu.dot_dimension_numbers<[1], [0], [0], [1], [0, 0, 1, 1], [], []>} : vector<64x512xbf16>, vector<512x32xbf16>, vector<64x32xf32> -> vector<64x32xf32>
    %3 = arith.mulf %2, %2 : vector<64x32xf32>
    %4 = tpu.concatenate %2, %3 in 0 : vector<64x32xf32>, vector<64x32xf32> -> vector<128x32xf32>
    %cst_3 = arith.constant dense<0.000000e+00> : vector<128xf32>
    %5 = vector.multi_reduction <add>, %4, %cst_3 [1] : vector<128x32xf32> to vector<128xf32>
    %6 = vector.shape_cast %5 : vector<128xf32> to vector<128x1xf32>
    %cst_4 = arith.constant 3.125000e-02 : f32
    %7 = vector.broadcast %cst_4 : f32 to vector<128x1xf32>
    %8 = arith.mulf %6, %7 : vector<128x1xf32>
    %9 = vector.extract_strided_slice %8 {offsets = [0, 0], sizes = [64, 1], strides = [1, 1]} : vector<128x1xf32> to vector<64x1xf32>
    %10 = vector.extract_strided_slice %8 {offsets = [64, 0], sizes = [64, 1], strides = [1, 1]} : vector<128x1xf32> to vector<64x1xf32>
    %11 = arith.mulf %9, %9 : vector<64x1xf32>
    %12 = arith.subf %10, %11 : vector<64x1xf32>
    %cst_5 = arith.constant 0.000000e+00 : f32
    %13 = vector.broadcast %cst_5 : f32 to vector<64x1xf32>
    %14 = arith.maximumf %12, %13 : vector<64x1xf32>
    %c0_6 = arith.constant 0 : index
    %c0_7 = arith.constant 0 : index
    %15 = vector.load %arg2[%c0_6, %c0_7] : memref<64x1xf32, #tpu.memory_space<vmem>>, vector<64x1xf32>
    %cst_8 = arith.constant 9.99999974E-6 : f32
    %16 = vector.broadcast %cst_8 : f32 to vector<64x1xf32>
    %17 = arith.addf %14, %16 : vector<64x1xf32>
    %18 = math.rsqrt %17 : vector<64x1xf32>
    %19 = arith.mulf %15, %18 : vector<64x1xf32>
    %c0_9 = arith.constant 0 : index
    %c0_10 = arith.constant 0 : index
    %20 = vector.load %arg3[%c0_9, %c0_10] : memref<64x1xf32, #tpu.memory_space<vmem>>, vector<64x1xf32>
    %21 = arith.mulf %9, %19 : vector<64x1xf32>
    %22 = arith.subf %20, %21 : vector<64x1xf32>
    %23 = vector.broadcast %19 : vector<64x1xf32> to vector<64x32xf32>
    %24 = arith.mulf %2, %23 : vector<64x32xf32>
    %25 = vector.broadcast %22 : vector<64x1xf32> to vector<64x32xf32>
    %26 = arith.addf %24, %25 : vector<64x32xf32>
    %cst_11 = arith.constant 0.000000e+00 : f32
    %27 = vector.broadcast %cst_11 : f32 to vector<64x32xf32>
    %28 = arith.cmpf oge, %26, %27 : vector<64x32xf32>
    %cst_12 = arith.constant 2.000000e-01 : f32
    %29 = vector.broadcast %cst_12 : f32 to vector<64x32xf32>
    %30 = arith.mulf %29, %26 : vector<64x32xf32>
    %31 = arith.select %28, %26, %30 : vector<64x32xi1>, vector<64x32xf32>
    %c0_13 = arith.constant 0 : index
    %c0_14 = arith.constant 0 : index
    %32 = vector.load %arg4[%c0_13, %c0_14] : memref<64x16xf32, #tpu.memory_space<vmem>>, vector<64x16xf32>
    %33 = tpu.concatenate %32, %32 in 1 : vector<64x16xf32>, vector<64x16xf32> -> vector<64x32xf32>
    %34 = arith.mulf %31, %33 : vector<64x32xf32>
    %35 = arith.truncf %34 : vector<64x32xf32> to vector<64x32xbf16>
    %36 = tpu.iota {dimensions = array<i32: 0>} : vector<32x2xi32>
    %37 = tpu.iota {dimensions = array<i32: 1>} : vector<32x2xi32>
    %c16_i32 = arith.constant 16 : i32
    %38 = vector.broadcast %c16_i32 : i32 to vector<32x2xi32>
    %39 = arith.muli %38, %37 : vector<32x2xi32>
    %40 = arith.cmpi sge, %36, %39 : vector<32x2xi32>
    %c16_i32_15 = arith.constant 16 : i32
    %41 = vector.broadcast %c16_i32_15 : i32 to vector<32x2xi32>
    %42 = arith.muli %41, %37 : vector<32x2xi32>
    %c16_i32_16 = arith.constant 16 : i32
    %43 = vector.broadcast %c16_i32_16 : i32 to vector<32x2xi32>
    %44 = arith.addi %42, %43 : vector<32x2xi32>
    %45 = arith.cmpi slt, %36, %44 : vector<32x2xi32>
    %46 = arith.andi %40, %45 : vector<32x2xi1>
    %cst_17 = arith.constant 1.000000e+00 : f32
    %cst_18 = arith.constant 0.000000e+00 : f32
    %47 = vector.broadcast %cst_17 : f32 to vector<32x2xf32>
    %48 = vector.broadcast %cst_18 : f32 to vector<32x2xf32>
    %49 = arith.select %46, %47, %48 : vector<32x2xi1>, vector<32x2xf32>
    %50 = arith.truncf %49 : vector<32x2xf32> to vector<32x2xbf16>
    %cst_19 = arith.constant dense<0.000000e+00> : vector<64x2xf32>
    %51 = tpu.matmul %35, %50, %cst_19 {dimension_numbers = #tpu.dot_dimension_numbers<[1], [0], [0], [1], [0, 0, 1, 1], [], []>} : vector<64x32xbf16>, vector<32x2xbf16>, vector<64x2xf32> -> vector<64x2xf32>
    %cst_20 = arith.constant dense<0.000000e+00> : vector<2xf32>
    %52 = vector.multi_reduction <add>, %51, %cst_20 [0] : vector<64x2xf32> to vector<2xf32>
    %53 = vector.shape_cast %52 : vector<2xf32> to vector<1x2xf32>
    %54 = arith.negf %53 : vector<1x2xf32>
    %55 = math.exp %54 : vector<1x2xf32>
    %cst_21 = arith.constant 1.000000e+00 : f32
    %56 = vector.broadcast %cst_21 : f32 to vector<1x2xf32>
    %57 = arith.addf %56, %55 : vector<1x2xf32>
    %58 = arith.divf %56, %57 : vector<1x2xf32>
    %c0_22 = arith.constant 0 : index
    %c0_23 = arith.constant 0 : index
    %59 = vector.load %arg5[%c0_22, %c0_23] : memref<1x2xf32, #tpu.memory_space<vmem>>, vector<1x2xf32>
    tpu.vector_store %arg5[%c0_22, %c0_23], %58 {strides = array<i32>} : memref<1x2xf32, #tpu.memory_space<vmem>>, vector<1x2xf32>,
    return
  }
}

</mosaic_0001>

<bundles_post_ra>
// kernel: discriminator_forward.4
= control target key start
LH: loop header
LB: loop body
LE: loop exit
PB: predicated region body
PF: predicated region fallthrough
CT: control target
= control target key end

     0   :  { %v830_v3 = vmov 0   ;;  %vm301_vm0 = vcmask 392192   ;;  %s1043_s1 = inlined_call_operand.vmem [shape: bf16[48,2048], index: 1, kind: input, shape index: {}]   ;;  %s1044_s0 = inlined_call_operand.vmem [shape: bf16[8,48], index: 0, kind: input, shape index: {}]   ;;  %s1045_s2 = inlined_call_operand.vmem [shape: bf16[8,2048], index: 2, kind: output, shape index: {}]  }
   0x1   :  { %v13_v0 = vld [vmem:[%s1043_s1] sm:$0xff]  ;;  %v14_v2 = vld [vmem:[%s1043_s1 + $0x8] sm:$0xff]  ;;  %337 = vmatprep.mubr.bf16.mxu0 %v830_v3  ;;  %378 = vmatprep.mubr.bf16.mxu1 %v830_v3  ;;  %v15_v23 = vld [vmem:[%s1043_s1 + $0x10] sm:$0xff] }
   0x2   :  { %v21_v1 = vld [vmem:[%s1043_s1 + $0x40] sm:$0xff]  ;;  %v22_v5 = vld [vmem:[%s1043_s1 + $0x48] sm:$0xff]  ;;  %v23_v24 = vld [vmem:[%s1043_s1 + $0x50] sm:$0xff] }
   0x3   :  { %v758_v4 = vcombine.high %v13_v0, %v21_v1  ;;  %v757_v6 = vcombine.low %v13_v0, %v21_v1  ;;  %v29_v7 = vld [vmem:[%s1043_s1 + $0x80] sm:$0xff]  ;;  %v760_v9 = vcombine.high %v14_v2, %v22_v5  ;;  %v759_v10 = vcombine.low %v14_v2, %v22_v5  ;;  %v30_v12 = vld [vmem:[%s1043_s1 + $0x88] sm:$0xff]  ;;  %v16_v25 = vld [vmem:[%s1043_s1 + $0x18] sm:$0xff] }
   0x4   :  { %v37_v8 = vld [vmem:[%s1043_s1 + $0xc0] sm:$0xff]  ;;  %v38_v13 = vld [vmem:[%s1043_s1 + $0xc8] sm:$0xff]  ;;  %v24_v26 = vld [vmem:[%s1043_s1 + $0x58] sm:$0xff]  ;;  %v762_v29 = vcombine.high %v15_v23, %v23_v24  ;;  %v761_v36 = vcombine.low %v15_v23, %v23_v24 }
   0x5   :  { %v774_v11 = vcombine.high %v29_v7, %v37_v8  ;;  %v45_v14 = vld [vmem:[%s1043_s1 + $0x100] sm:$0xff]  ;;  %305 = vmatprep.subr.bf16.mxu0 %v758_v4  ;;  %v776_v15 = vcombine.high %v30_v12, %v38_v13  ;;  %v46_v17 = vld [vmem:[%s1043_s1 + $0x108] sm:$0xff]  ;;  %346 = vmatprep.subr.bf16.mxu1 %v760_v9  ;;  %v773_v19 = vcombine.low %v29_v7, %v37_v8  ;;  %v31_v31 = vld [vmem:[%s1043_s1 + $0x90] sm:$0xff] }
   0x6   :  { %v53_v16 = vld [vmem:[%s1043_s1 + $0x140] sm:$0xff]  ;;  %v54_v18 = vld [vmem:[%s1043_s1 + $0x148] sm:$0xff]  ;;  %306 = vmatpush1.bf16.msra.mxu0 %v757_v6  ;;  %347 = vmatpush1.bf16.msra.mxu1 %v759_v10  ;;  %v775_v20 = vcombine.low %v30_v12, %v38_v13  ;;  %v764_v30 = vcombine.high %v16_v25, %v24_v26  ;;  %v39_v32 = vld [vmem:[%s1043_s1 + $0xd0] sm:$0xff]  ;;  %v763_v37 = vcombine.low %v16_v25, %v24_v26 }
   0x7   :  { %307 = vmatprep.subr.bf16.mxu0 %v774_v11  ;;  %v790_v21 = vcombine.high %v45_v14, %v53_v16  ;;  %348 = vmatprep.subr.bf16.mxu1 %v776_v15  ;;  %v792_v22 = vcombine.high %v46_v17, %v54_v18  ;;  %v789_v27 = vcombine.low %v45_v14, %v53_v16  ;;  %v32_v33 = vld [vmem:[%s1043_s1 + $0x98] sm:$0xff]  ;;  %v911_v35 = vld [vmem:[%s1044_s0] sm:$0xf]  ;;  %v47_v40 = vld [vmem:[%s1043_s1 + $0x110] sm:$0xff] }
   0x8   :  { %v791_v28 = vcombine.low %v46_v17, %v54_v18  ;;  %v40_v34 = vld [vmem:[%s1043_s1 + $0xd8] sm:$0xff]  ;;  %v778_v38 = vcombine.high %v31_v31, %v39_v32  ;;  %v55_v41 = vld [vmem:[%s1043_s1 + $0x150] sm:$0xff]  ;;  %v777_v44 = vcombine.low %v31_v31, %v39_v32  ;;  %v17_v48 = vld [vmem:[%s1043_s1 + $0x20] sm:$0xff] }
   0x9   :  { %v780_v39 = vcombine.high %v32_v33, %v40_v34  ;;  %v48_v42 = vld [vmem:[%s1043_s1 + $0x118] sm:$0xff]  ;;  %v779_v45 = vcombine.low %v32_v33, %v40_v34  ;;  %v794_v46 = vcombine.high %v47_v40, %v55_v41  ;;  %v25_v49 = vld [vmem:[%s1043_s1 + $0x60] sm:$0xff]  ;;  %v18_v50 = vld [vmem:[%s1043_s1 + $0x28] sm:$0xff]  ;;  %v793_v52 = vcombine.low %v47_v40, %v55_v41 }
   0xa   :  { %308 = vmatpush1.bf16.msra.mxu0 %v773_v19  ;;  %349 = vmatpush1.bf16.msra.mxu1 %v775_v20  ;;  %v56_v43 = vld [vmem:[%s1043_s1 + $0x158] sm:$0xff]  ;;  %v26_v51 = vld [vmem:[%s1043_s1 + $0x68] sm:$0xff]  ;;  %v766_v54 = vcombine.high %v17_v48, %v25_v49  ;;  %v33_v56 = vld [vmem:[%s1043_s1 + $0xa0] sm:$0xff]  ;;  %v765_v60 = vcombine.low %v17_v48, %v25_v49 }
   0xb   :  { %309 = vmatprep.subr.bf16.mxu0 %v790_v21  ;;  %350 = vmatprep.subr.bf16.mxu1 %v792_v22  ;;  %v796_v47 = vcombine.high %v48_v42, %v56_v43  ;;  %v795_v53 = vcombine.low %v48_v42, %v56_v43  ;;  %v768_v55 = vcombine.high %v18_v50, %v26_v51  ;;  %v41_v57 = vld [vmem:[%s1043_s1 + $0xe0] sm:$0xff]  ;;  %v34_v58 = vld [vmem:[%s1043_s1 + $0xa8] sm:$0xff]  ;;  %v19_v9 = vld [vmem:[%s1043_s1 + $0x30] sm:$0xff] }
   0xc   :  { %v42_v59 = vld [vmem:[%s1043_s1 + $0xe8] sm:$0xff]  ;;  %v767_v61 = vcombine.low %v18_v50, %v26_v51  ;;  %v782_v62 = vcombine.high %v33_v56, %v41_v57  ;;  %v49_v0 = vld [vmem:[%s1043_s1 + $0x120] sm:$0xff]  ;;  %v781_v5 = vcombine.low %v33_v56, %v41_v57  ;;  %v27_v10 = vld [vmem:[%s1043_s1 + $0x70] sm:$0xff] }
   0xd   :  { %v784_v63 = vcombine.high %v34_v58, %v42_v59  ;;  %v57_v1 = vld [vmem:[%s1043_s1 + $0x160] sm:$0xff]  ;;  %v50_v2 = vld [vmem:[%s1043_s1 + $0x128] sm:$0xff]  ;;  %v783_v6 = vcombine.low %v34_v58, %v42_v59  ;;  %v20_v11 = vld [vmem:[%s1043_s1 + $0x38] sm:$0xff]  ;;  %v770_v15 = vcombine.high %v19_v9, %v27_v10  ;;  %v769_v21 = vcombine.low %v19_v9, %v27_v10 }
   0xe   :  { %310 = vmatpush1.bf16.msra.mxu0 %v789_v27  ;;  %351 = vmatpush1.bf16.msra.mxu1 %v791_v28  ;;  %v58_v4 = vld [vmem:[%s1043_s1 + $0x168] sm:$0xff]  ;;  %v798_v7 = vcombine.high %v49_v0, %v57_v1  ;;  %v28_v12 = vld [vmem:[%s1043_s1 + $0x78] sm:$0xff]  ;;  %v797_v13 = vcombine.low %v49_v0, %v57_v1  ;;  %v35_v17 = vld [vmem:[%s1043_s1 + $0xb0] sm:$0xff] }
   0xf   :  { %387 = vmatprep.subr.bf16.mxu0 %v762_v29  ;;  %428 = vmatprep.subr.bf16.mxu1 %v764_v30  ;;  %v800_v8 = vcombine.high %v50_v2, %v58_v4  ;;  %v799_v14 = vcombine.low %v50_v2, %v58_v4  ;;  %v772_v16 = vcombine.high %v20_v11, %v28_v12  ;;  %v43_v18 = vld [vmem:[%s1043_s1 + $0xf0] sm:$0xff]  ;;  %v36_v19 = vld [vmem:[%s1043_s1 + $0xb8] sm:$0xff] }
  0x10   :  { %v44_v20 = vld [vmem:[%s1043_s1 + $0xf8] sm:$0xff]  ;;  %v771_v22 = vcombine.low %v20_v11, %v28_v12  ;;  %v786_v23 = vcombine.high %v35_v17, %v43_v18  ;;  %v51_v25 = vld [vmem:[%s1043_s1 + $0x130] sm:$0xff]  ;;  %v785_v29 = vcombine.low %v35_v17, %v43_v18 }
  0x11   :  { %805 = vmatmul.mubr.msk.bf16.vlgmr.msra.gmra.mrb[0].mxu0 %vm301_vm0, %v911_v35  ;;  %806 = vmatmul.mubr.msk.bf16.vlgmr.msra.gmra.mrb[0].mxu1 %vm301_vm0, %v911_v35  ;;  %v788_v24 = vcombine.high %v36_v19, %v44_v20  ;;  %v59_v26 = vld [vmem:[%s1043_s1 + $0x170] sm:$0xff]  ;;  %v52_v27 = vld [vmem:[%s1043_s1 + $0x138] sm:$0xff]  ;;  %v787_v30 = vcombine.low %v36_v19, %v44_v20 }
  0x12   :  { %388 = vmatpush1.bf16.msra.mxu0 %v761_v36  ;;  %429 = vmatpush1.bf16.msra.mxu1 %v763_v37  ;;  %v60_v28 = vld [vmem:[%s1043_s1 + $0x178] sm:$0xff]  ;;  %v802_v31 = vcombine.high %v51_v25, %v59_v26  ;;  %v801_v33 = vcombine.low %v51_v25, %v59_v26 }
  0x13   :  { %389 = vmatprep.subr.bf16.mxu0 %v778_v38  ;;  %430 = vmatprep.subr.bf16.mxu1 %v780_v39  ;;  %v804_v32 = vcombine.high %v52_v27, %v60_v28  ;;  %v803_v34 = vcombine.low %v52_v27, %v60_v28 }
  0x14   :  { %419 = vmatprep.mubr.bf16.mxu0 %v830_v3  ;;  %460 = vmatprep.mubr.bf16.mxu1 %v830_v3 }
  0x16   :  { %390 = vmatpush1.bf16.msra.mxu0 %v777_v44  ;;  %431 = vmatpush1.bf16.msra.mxu1 %v779_v45 }
  0x17   :  { %391 = vmatprep.subr.bf16.mxu0 %v794_v46  ;;  %432 = vmatprep.subr.bf16.mxu1 %v796_v47 }
  0x1a   :  { %392 = vmatpush1.bf16.msra.mxu0 %v793_v52  ;;  %433 = vmatpush1.bf16.msra.mxu1 %v795_v53 }
  0x1b   :  { %469 = vmatprep.subr.bf16.mxu0 %v766_v54  ;;  %510 = vmatprep.subr.bf16.mxu1 %v768_v55 }
  0x1d   :  { %807 = vmatmul.mubr.msk.bf16.vlgmr.msra.gmra.mrb[4].mxu0 %vm301_vm0, %v911_v35  ;;  %808 = vmatmul.mubr.msk.bf16.vlgmr.msra.gmra.mrb[4].mxu1 %vm301_vm0, %v911_v35 }
  0x1e   :  { %470 = vmatpush1.bf16.msra.mxu0 %v765_v60  ;;  %511 = vmatpush1.bf16.msra.mxu1 %v767_v61 }
  0x1f   :  { %471 = vmatprep.subr.bf16.mxu0 %v782_v62  ;;  %512 = vmatprep.subr.bf16.mxu1 %v784_v63 }
  0x20   :  { %501 = vmatprep.mubr.bf16.mxu0 %v830_v3  ;;  %542 = vmatprep.mubr.bf16.mxu1 %v830_v3 }
  0x22   :  { %472 = vmatpush1.bf16.msra.mxu0 %v781_v5  ;;  %513 = vmatpush1.bf16.msra.mxu1 %v783_v6 }
  0x23   :  { %473 = vmatprep.subr.bf16.mxu0 %v798_v7  ;;  %514 = vmatprep.subr.bf16.mxu1 %v800_v8 }
  0x26   :  { %474 = vmatpush1.bf16.msra.mxu0 %v797_v13  ;;  %515 = vmatpush1.bf16.msra.mxu1 %v799_v14 }
  0x27   :  { %551 = vmatprep.subr.bf16.mxu0 %v770_v15  ;;  %592 = vmatprep.subr.bf16.mxu1 %v772_v16 }
  0x29   :  { %809 = vmatmul.mubr.msk.bf16.vlgmr.msra.gmra.mrb[8].mxu0 %vm301_vm0, %v911_v35  ;;  %810 = vmatmul.mubr.msk.bf16.vlgmr.msra.gmra.mrb[8].mxu1 %vm301_vm0, %v911_v35 }
  0x2a   :  { %552 = vmatpush1.bf16.msra.mxu0 %v769_v21  ;;  %593 = vmatpush1.bf16.msra.mxu1 %v771_v22 }
  0x2b   :  { %553 = vmatprep.subr.bf16.mxu0 %v786_v23  ;;  %594 = vmatprep.subr.bf16.mxu1 %v788_v24 }
  0x2c   :  { %583 = vmatprep.mubr.bf16.mxu0 %v830_v3  ;;  %624 = vmatprep.mubr.bf16.mxu1 %v830_v3 }
  0x2e   :  { %554 = vmatpush1.bf16.msra.mxu0 %v785_v29  ;;  %595 = vmatpush1.bf16.msra.mxu1 %v787_v30 }
  0x2f   :  { %555 = vmatprep.subr.bf16.mxu0 %v802_v31  ;;  %596 = vmatprep.subr.bf16.mxu1 %v804_v32 }
  0x32   :  { %556 = vmatpush1.bf16.msra.mxu0 %v801_v33  ;;  %597 = vmatpush1.bf16.msra.mxu1 %v803_v34 }
  0x35   :  { %811 = vmatmul.mubr.msk.bf16.vlgmr.msra.gmra.mrb[12].mxu0 %vm301_vm0, %v911_v35  ;;  %812 = vmatmul.mubr.msk.bf16.vlgmr.msra.gmra.mrb[12].mxu1 %vm301_vm0, %v911_v35 }
  0xe4   :  { %v339_v36 = vpop.f32.mrb[0].mxu0  ;;  %v380_v38 = vpop.f32.mrb[0].mxu1 }
  0xe5   :  { %vm633_vm1 = vcmp.ge.f32.partialorder %v339_v36, 0.0  ;;  %v649_v37 = vmul.f32 0.2, %v339_v36  ;;  %v341_v39 = vpop.f32.mrb[1].mxu0  ;;  %vm635_vm2 = vcmp.ge.f32.partialorder %v380_v38, 0.0  ;;  %v382_v42 = vpop.f32.mrb[1].mxu1 }
  0xe6   :  { %v651_v3 = vmul.f32 0.2, %v380_v38  ;;  %vm634_vm3 = vcmp.ge.f32.partialorder %v341_v39, 0.0  ;;  %v650_v40 = vmul.f32 0.2, %v341_v39  ;;  %v343_v43 = vpop.f32.mrb[2].mxu0 }
  0xe7   :  { %v665_v41 = vsel %vm633_vm1, %v339_v36, %v649_v37  ;;  %vm636_vm4 = vcmp.ge.f32.partialorder %v382_v42, 0.0  ;;  %v652_v46 = vmul.f32 0.2, %v382_v42  ;;  %v384_v47 = vpop.f32.mrb[2].mxu1  ;;  %v344_v48 = vpop.f32.mrb[3].mxu0 }
  0xe8   :  { %v667_v44 = vsel %vm635_vm2, %v380_v38, %v651_v3  ;;  %v666_v45 = vsel %vm634_vm3, %v341_v39, %v650_v40  ;;  %v385_v35 = vpop.f32.mrb[3].mxu1 }
  0xe9   :  { %v821_v49 = vpack.c.bf16 %v666_v45, %v665_v41  ;;  %v668_v50 = vsel %vm636_vm4, %v382_v42, %v652_v46 }
  0xea   :  { %v822_v51 = vpack.c.bf16 %v668_v50, %v667_v44 }
  0xeb   :  { %745 = vst [vmem:[%s1045_s2] sm:$0xff] %v821_v49 }
  0xec   :  { %746 = vst [vmem:[%s1045_s2 + $0x8] sm:$0xff] %v822_v51 }
  0xf0   :  { %v421_v52 = vpop.f32.mrb[4].mxu0  ;;  %v462_v54 = vpop.f32.mrb[4].mxu1 }
  0xf1   :  { %vm637_vm5 = vcmp.ge.f32.partialorder %v421_v52, 0.0  ;;  %v653_v53 = vmul.f32 0.2, %v421_v52  ;;  %v423_v55 = vpop.f32.mrb[5].mxu0  ;;  %vm639_vm6 = vcmp.ge.f32.partialorder %v462_v54, 0.0  ;;  %v464_v59 = vpop.f32.mrb[5].mxu1 }
  0xf2   :  { %v655_v56 = vmul.f32 0.2, %v462_v54  ;;  %vm638_vm7 = vcmp.ge.f32.partialorder %v423_v55, 0.0  ;;  %v654_v57 = vmul.f32 0.2, %v423_v55  ;;  %v425_v60 = vpop.f32.mrb[6].mxu0 }
  0xf3   :  { %v669_v58 = vsel %vm637_vm5, %v421_v52, %v653_v53  ;;  %vm640_vm8 = vcmp.ge.f32.partialorder %v464_v59, 0.0  ;;  %v656_v63 = vmul.f32 0.2, %v464_v59  ;;  %v466_v0 = vpop.f32.mrb[6].mxu1  ;;  %v426_v1 = vpop.f32.mrb[7].mxu0 }
  0xf4   :  { %v671_v61 = vsel %vm639_vm6, %v462_v54, %v655_v56  ;;  %v670_v62 = vsel %vm638_vm7, %v423_v55, %v654_v57  ;;  %v467_v4 = vpop.f32.mrb[7].mxu1 }
  0xf5   :  { %v823_v2 = vpack.c.bf16 %v670_v62, %v669_v58  ;;  %v672_v5 = vsel %vm640_vm8, %v464_v59, %v656_v63 }
  0xf6   :  { %v824_v6 = vpack.c.bf16 %v672_v5, %v671_v61 }
  0xf7   :  { %747 = vst [vmem:[%s1045_s2 + $0x10] sm:$0xff] %v823_v2 }
  0xf8   :  { %748 = vst [vmem:[%s1045_s2 + $0x18] sm:$0xff] %v824_v6 }
  0xfc   :  { %v503_v7 = vpop.f32.mrb[8].mxu0  ;;  %v544_v9 = vpop.f32.mrb[8].mxu1 }
  0xfd   :  { %vm641_vm9 = vcmp.ge.f32.partialorder %v503_v7, 0.0  ;;  %v657_v8 = vmul.f32 0.2, %v503_v7  ;;  %v505_v10 = vpop.f32.mrb[9].mxu0  ;;  %vm643_vm10 = vcmp.ge.f32.partialorder %v544_v9, 0.0  ;;  %v546_v14 = vpop.f32.mrb[9].mxu1 }
  0xfe   :  { %v659_v11 = vmul.f32 0.2, %v544_v9  ;;  %vm642_vm11 = vcmp.ge.f32.partialorder %v505_v10, 0.0  ;;  %v658_v12 = vmul.f32 0.2, %v505_v10  ;;  %v507_v15 = vpop.f32.mrb[10].mxu0 }
  0xff   :  { %v673_v13 = vsel %vm641_vm9, %v503_v7, %v657_v8  ;;  %vm644_vm12 = vcmp.ge.f32.partialorder %v546_v14, 0.0  ;;  %v660_v18 = vmul.f32 0.2, %v546_v14  ;;  %v548_v19 = vpop.f32.mrb[10].mxu1  ;;  %v508_v20 = vpop.f32.mrb[11].mxu0 }
 0x100   :  { %v675_v16 = vsel %vm643_vm10, %v544_v9, %v659_v11  ;;  %v674_v17 = vsel %vm642_vm11, %v505_v10, %v658_v12  ;;  %v549_v22 = vpop.f32.mrb[11].mxu1 }
 0x101   :  { %v825_v21 = vpack.c.bf16 %v674_v17, %v673_v13  ;;  %v676_v23 = vsel %vm644_vm12, %v546_v14, %v660_v18 }
 0x102   :  { %v826_v24 = vpack.c.bf16 %v676_v23, %v675_v16 }
 0x103   :  { %749 = vst [vmem:[%s1045_s2 + $0x20] sm:$0xff] %v825_v21 }
 0x104   :  { %750 = vst [vmem:[%s1045_s2 + $0x28] sm:$0xff] %v826_v24 }
 0x108   :  { %v585_v25 = vpop.f32.mrb[12].mxu0  ;;  %v626_v27 = vpop.f32.mrb[12].mxu1 }
 0x109   :  { %vm645_vm13 = vcmp.ge.f32.partialorder %v585_v25, 0.0  ;;  %v661_v26 = vmul.f32 0.2, %v585_v25  ;;  %v587_v28 = vpop.f32.mrb[13].mxu0  ;;  %vm647_vm14 = vcmp.ge.f32.partialorder %v626_v27, 0.0  ;;  %v628_v32 = vpop.f32.mrb[13].mxu1 }
 0x10a   :  { %v663_v29 = vmul.f32 0.2, %v626_v27  ;;  %vm646_vm15 = vcmp.ge.f32.partialorder %v587_v28, 0.0  ;;  %v662_v30 = vmul.f32 0.2, %v587_v28  ;;  %v589_v33 = vpop.f32.mrb[14].mxu0 }
 0x10b   :  { %v677_v31 = vsel %vm645_vm13, %v585_v25, %v661_v26  ;;  %vm648_vm0 = vcmp.ge.f32.partialorder %v628_v32, 0.0  ;;  %v664_v37 = vmul.f32 0.2, %v628_v32  ;;  %v630_v38 = vpop.f32.mrb[14].mxu1  ;;  %v590_v39 = vpop.f32.mrb[15].mxu0 }
 0x10c   :  { %v679_v34 = vsel %vm647_vm14, %v626_v27, %v663_v29  ;;  %v678_v36 = vsel %vm646_vm15, %v587_v28, %v662_v30  ;;  %v631_v40 = vpop.f32.mrb[15].mxu1 }
 0x10d   :  { %v827_v3 = vpack.c.bf16 %v678_v36, %v677_v31  ;;  %v680_v41 = vsel %vm648_vm0, %v628_v32, %v664_v37 }
 0x10e   :  { %v828_v42 = vpack.c.bf16 %v680_v41, %v679_v34 }
 0x10f   :  { %751 = vst [vmem:[%s1045_s2 + $0x30] sm:$0xff] %v827_v3 }
 0x110   :  { %752 = vst [vmem:[%s1045_s2 + $0x38] sm:$0xff] %v828_v42 }

// kernel: discriminator_forward.5
= control target key start
LH: loop header
LB: loop body
LE: loop exit
PB: predicated region body
PF: predicated region fallthrough
CT: control target
= control target key end

     0   :  { %v545_v1 = vmov 0   ;;  %s742_s1 = inlined_call_operand.vmem [shape: bf16[128,512], index: 1, kind: input, shape index: {}]   ;;  %s743_s0 = inlined_call_operand.vmem [shape: bf16[16,128], index: 0, kind: input, shape index: {}]   ;;  %s744_s2 = inlined_call_operand.vmem [shape: f32[16,1], index: 2, kind: input, shape index: {}]   ;;  %s745_s3 = inlined_call_operand.vmem [shape: f32[16,1], index: 3, kind: input, shape index: {}]   ;;  %s746_s4 = inlined_call_operand.vmem [shape: bf16[16,512], index: 4, kind: output, shape index: {}]  }
   0x1   :  { %v492_v0 = vld [vmem:[%s742_s1 + $0x4] ss:$16 sps:$4 sm:$0xff]   ;;  %250 = vmatprep.mubr.bf16.mxu0 %v545_v1  ;;  %293 = vmatprep.mubr.bf16.mxu1 %v545_v1  ;;  %v494_v2 = vld [vmem:[%s742_s1 + $0xc] ss:$16 sps:$4 sm:$0xff]   ;;  %v496_v3 = vld [vmem:[%s742_s1] ss:$16 sps:$4 sm:$0xff]  }
   0x2   :  { %490 = vset.pattern.permute.xlu0 %v545_v1  ;;  %491 = vset.pattern.permute.xlu1 %v545_v1  ;;  %v497_v4 = vld [vmem:[%s742_s1 + $0x8] ss:$16 sps:$4 sm:$0xff]   ;;  %v498_v5 = vld [vmem:[%s742_s1 + $0x24] ss:$16 sps:$4 sm:$0xff]   ;;  %v500_v6 = vld [vmem:[%s742_s1 + $0x2c] ss:$16 sps:$4 sm:$0xff]  }
   0x3   :  { %218 = vmatprep.subr.bf16.mxu0 %v492_v0  ;;  %261 = vmatprep.subr.bf16.mxu1 %v494_v2  ;;  %v502_v7 = vld [vmem:[%s742_s1 + $0x20] ss:$16 sps:$4 sm:$0xff]   ;;  %v503_v8 = vld [vmem:[%s742_s1 + $0x28] ss:$16 sps:$4 sm:$0xff]   ;;  %v504_v9 = vld [vmem:[%s742_s1 + $0x44] ss:$16 sps:$4 sm:$0xff]  }
   0x4   :  { %219 = vmatpush1.bf16.msra.mxu0 %v496_v3  ;;  %262 = vmatpush1.bf16.msra.mxu1 %v497_v4  ;;  %v506_v10 = vld [vmem:[%s742_s1 + $0x4c] ss:$16 sps:$4 sm:$0xff]   ;;  %v508_v11 = vld [vmem:[%s742_s1 + $0x40] ss:$16 sps:$4 sm:$0xff]   ;;  %v509_v12 = vld [vmem:[%s742_s1 + $0x48] ss:$16 sps:$4 sm:$0xff]  }
   0x5   :  { %220 = vmatprep.subr.bf16.mxu0 %v498_v5  ;;  %263 = vmatprep.subr.bf16.mxu1 %v500_v6  ;;  %v510_v13 = vld [vmem:[%s742_s1 + $0x64] ss:$16 sps:$4 sm:$0xff]   ;;  %v512_v14 = vld [vmem:[%s742_s1 + $0x6c] ss:$16 sps:$4 sm:$0xff]   ;;  %v514_v15 = vld [vmem:[%s742_s1 + $0x60] ss:$16 sps:$4 sm:$0xff]  }
   0x6   :  { %v515_v16 = vld [vmem:[%s742_s1 + $0x68] ss:$16 sps:$4 sm:$0xff]   ;;  %v516_v17 = vld [vmem:[%s742_s1 + $0x84] ss:$16 sps:$4 sm:$0xff]   ;;  %v518_v18 = vld [vmem:[%s742_s1 + $0x8c] ss:$16 sps:$4 sm:$0xff]  }
   0x7   :  { %v520_v19 = vld [vmem:[%s742_s1 + $0x80] ss:$16 sps:$4 sm:$0xff]   ;;  %v521_v20 = vld [vmem:[%s742_s1 + $0x88] ss:$16 sps:$4 sm:$0xff]   ;;  %v522_v21 = vld [vmem:[%s742_s1 + $0xa4] ss:$16 sps:$4 sm:$0xff]  }
   0x8   :  { %221 = vmatpush1.bf16.msra.mxu0 %v502_v7  ;;  %264 = vmatpush1.bf16.msra.mxu1 %v503_v8  ;;  %v524_v22 = vld [vmem:[%s742_s1 + $0xac] ss:$16 sps:$4 sm:$0xff]   ;;  %v526_v23 = vld [vmem:[%s742_s1 + $0xa0] ss:$16 sps:$4 sm:$0xff]   ;;  %v527_v24 = vld [vmem:[%s742_s1 + $0xa8] ss:$16 sps:$4 sm:$0xff]  }
   0x9   :  { %222 = vmatprep.subr.bf16.mxu0 %v504_v9  ;;  %265 = vmatprep.subr.bf16.mxu1 %v506_v10  ;;  %v528_v25 = vld [vmem:[%s742_s1 + $0xc4] ss:$16 sps:$4 sm:$0xff]   ;;  %v530_v26 = vld [vmem:[%s742_s1 + $0xcc] ss:$16 sps:$4 sm:$0xff]   ;;  %v532_v27 = vld [vmem:[%s742_s1 + $0xc0] ss:$16 sps:$4 sm:$0xff]  }
   0xa   :  { %v533_v28 = vld [vmem:[%s742_s1 + $0xc8] ss:$16 sps:$4 sm:$0xff]   ;;  %v534_v29 = vld [vmem:[%s742_s1 + $0xe4] ss:$16 sps:$4 sm:$0xff]   ;;  %v536_v30 = vld [vmem:[%s742_s1 + $0xec] ss:$16 sps:$4 sm:$0xff]  }
   0xb   :  { %v538_v31 = vld [vmem:[%s742_s1 + $0xe0] ss:$16 sps:$4 sm:$0xff]   ;;  %v539_v32 = vld [vmem:[%s742_s1 + $0xe8] ss:$16 sps:$4 sm:$0xff]  }
   0xc   :  { %223 = vmatpush1.bf16.msra.mxu0 %v508_v11  ;;  %266 = vmatpush1.bf16.msra.mxu1 %v509_v12  ;;  %v540_v33 = vld [vmem:[%s743_s0] sm:$0xff]  }
   0xd   :  { %224 = vmatprep.subr.bf16.mxu0 %v510_v13  ;;  %267 = vmatprep.subr.bf16.mxu1 %v512_v14  ;;  %v342_v14 = vld [vmem:[%s744_s2] sm:$0xff] }
  0x10   :  { %225 = vmatpush1.bf16.msra.mxu0 %v514_v15  ;;  %268 = vmatpush1.bf16.msra.mxu1 %v515_v16 }
  0x11   :  { %226 = vmatprep.subr.bf16.mxu0 %v516_v17  ;;  %269 = vmatprep.subr.bf16.mxu1 %v518_v18  ;;  %v343_v17 = vld [vmem:[%s744_s2 + $0x8] sm:$0xff] }
  0x14   :  { %227 = vmatpush1.bf16.msra.mxu0 %v520_v19  ;;  %270 = vmatpush1.bf16.msra.mxu1 %v521_v20 }
  0x15   :  { %228 = vmatprep.subr.bf16.mxu0 %v522_v21  ;;  %271 = vmatprep.subr.bf16.mxu1 %v524_v22  ;;  %v350_v21 = vld [vmem:[%s745_s3] sm:$0xff] }
  0x18   :  { %229 = vmatpush1.bf16.msra.mxu0 %v526_v23  ;;  %272 = vmatpush1.bf16.msra.mxu1 %v527_v24  ;;  %v351_v24 = vld [vmem:[%s745_s3 + $0x8] sm:$0xff] }
  0x19   :  { %230 = vmatprep.subr.bf16.mxu0 %v528_v25  ;;  %273 = vmatprep.subr.bf16.mxu1 %v530_v26 }
  0x1c   :  { %231 = vmatpush1.bf16.msra.mxu0 %v532_v27  ;;  %274 = vmatpush1.bf16.msra.mxu1 %v533_v28 }
  0x1d   :  { %232 = vmatprep.subr.bf16.mxu0 %v534_v29  ;;  %275 = vmatprep.subr.bf16.mxu1 %v536_v30 }
  0x20   :  { %233 = vmatpush1.bf16.msra.mxu0 %v538_v31  ;;  %276 = vmatpush1.bf16.msra.mxu1 %v539_v32 }
  0x23   :  { %251 = vmatmul.mubr.bf16.vlgmr.msra.gmra.mrb[0].mxu0 %v540_v33  ;;  %294 = vmatmul.mubr.bf16.vlgmr.msra.gmra.mrb[0].mxu1 %v540_v33 }
  0xf6   :  { %v670_v34 = vpop.f32.mrb[0].mxu0  ;;  %v672_v35 = vpop.f32.mrb[0].mxu1 }
  0xf7   :  { %v304_v36 = vmul.f32 %v670_v34, %v670_v34  ;;  %v676_v37 = vpop.f32.mrb[1].mxu0  ;;  %v678_v38 = vpop.f32.mrb[1].mxu1  ;;  %v306_v43 = vmul.f32 %v672_v35, %v672_v35 }
  0xf8   :  { %v305_v39 = vmul.f32 %v676_v37, %v676_v37  ;;  %v312_v40 = vadd.f32 %v676_v37, %v670_v34  ;;  %v684_v41 = vpop.f32.mrb[2].mxu0  ;;  %v686_v42 = vpop.f32.mrb[2].mxu1  ;;  %v307_v55 = vmul.f32 %v678_v38, %v678_v38 }
  0xf9   :  { %v308_v44 = vmul.f32 %v684_v41, %v684_v41  ;;  %v692_v45 = vpop.f32.mrb[3].mxu0  ;;  %v694_v46 = vpop.f32.mrb[3].mxu1  ;;  %v310_v51 = vmul.f32 %v686_v42, %v686_v42 }
  0xfa   :  { %v309_v47 = vmul.f32 %v692_v45, %v692_v45  ;;  %v317_v48 = vadd.f32 %v692_v45, %v684_v41  ;;  %v313_v49 = vadd.f32 %v312_v40, %v672_v35  ;;  %v322_v50 = vadd.f32 %v305_v39, %v304_v36 }
  0xfb   :  { %v311_v57 = vmul.f32 %v694_v46, %v694_v46 }
  0xfc   :  { %v327_v52 = vadd.f32 %v309_v47, %v308_v44  ;;  %v314_v53 = vadd.f32 %v313_v49, %v678_v38  ;;  %v318_v54 = vadd.f32 %v317_v48, %v686_v42  ;;  %v323_v56 = vadd.f32 %v322_v50, %v306_v43 }
  0xfe   :  { %315 = vadd.xlane.f32.xlu0 %v314_v53  ;;  %v319_v58 = vadd.f32 %v318_v54, %v694_v46  ;;  %v328_v59 = vadd.f32 %v327_v52, %v310_v51  ;;  %v324_v60 = vadd.f32 %v323_v56, %v307_v55 }
 0x100   :  { %v329_v61 = vadd.f32 %v328_v59, %v311_v57  ;;  %325 = vadd.xlane.f32.xlu1 %v324_v60 }
 0x102   :  { %320 = vadd.xlane.f32.xlu0 %v319_v58 }
 0x104   :  { %330 = vadd.xlane.f32.xlu1 %v329_v61 }
 0x18b   :  { %v316_v62 = vpop.xlane.xlu0 %315 }
 0x18c   :  { %v332_v63 = vmul.f32 0.001953125, %v316_v62 }
 0x18d   :  { %v326_v1 = vpop.xlane.xlu1 %325 }
 0x18e   :  { %v336_v0 = vmul.f32 %v332_v63, %v332_v63  ;;  %v334_v2 = vmul.f32 0.001953125, %v326_v1 }
 0x18f   :  { %v321_v3 = vpop.xlane.xlu0 %320 }
 0x190   :  { %v333_v4 = vmul.f32 0.001953125, %v321_v3  ;;  %v338_v5 = vsub.f32 %v334_v2, %v336_v0 }
 0x191   :  { %v331_v7 = vpop.xlane.xlu1 %330 }
 0x192   :  { %v337_v6 = vmul.f32 %v333_v4, %v333_v4  ;;  %v340_v8 = vmax.f32 %v338_v5, 0.0  ;;  %v335_v9 = vmul.f32 0.001953125, %v331_v7 }
 0x194   :  { %v344_v10 = vadd.f32 1e-05, %v340_v8  ;;  %v339_v11 = vsub.f32 %v335_v9, %v337_v6 }
 0x196   :  { %541 = vrsqrt.f32 %v344_v10  ;;  %v341_v12 = vmax.f32 %v339_v11, 0.0 }
 0x198   :  { %v345_v13 = vadd.f32 1e-05, %v341_v12 }
 0x19a   :  { %543 = vrsqrt.f32 %v345_v13 }
 0x1a0   :  { %v542_v15 = vpop.eup %541 }
 0x1a1   :  { %v348_v16 = vmul.f32 %v542_v15, %v342_v14 }
 0x1a3   :  { %358 = vperm.xlu0 %490, %v348_v16   ;;  %v352_v20 = vmul.f32 %v348_v16, %v332_v63 }
 0x1a4   :  { %v544_v18 = vpop.eup %543 }
 0x1a5   :  { %v349_v19 = vmul.f32 %v544_v18, %v343_v17  ;;  %v354_v22 = vsub.f32 %v350_v21, %v352_v20 }
 0x1a7   :  { %363 = vperm.xlu1 %491, %v349_v19   ;;  %v353_v23 = vmul.f32 %v349_v19, %v333_v4 }
 0x1a9   :  { %v355_v25 = vsub.f32 %v351_v24, %v353_v23 }
 0x1ab   :  { %376 = vperm.xlu1 %491, %v354_v22  }
 0x1af   :  { %381 = vperm.xlu1 %491, %v355_v25  }
 0x222   :  { %v359_v26 = vpop.permute.xlu0 %358 }
 0x223   :  { %v366_v28 = vmul.f32 %v359_v26, %v670_v34  ;;  %v367_v29 = vmul.f32 %v359_v26, %v676_v37  ;;  %v368_v30 = vmul.f32 %v359_v26, %v672_v35  ;;  %v369_v31 = vmul.f32 %v359_v26, %v678_v38 }
 0x226   :  { %v364_v27 = vpop.permute.xlu1 %363 }
 0x227   :  { %v370_v43 = vmul.f32 %v364_v27, %v684_v41  ;;  %v371_v44 = vmul.f32 %v364_v27, %v692_v45  ;;  %v372_v47 = vmul.f32 %v364_v27, %v686_v42  ;;  %v373_v38 = vmul.f32 %v364_v27, %v694_v46 }
 0x22a   :  { %v377_v32 = vpop.permute.xlu1 %376 }
 0x22b   :  { %v384_v33 = vadd.f32 %v377_v32, %v366_v28  ;;  %v385_v36 = vadd.f32 %v377_v32, %v367_v29  ;;  %v386_v39 = vadd.f32 %v377_v32, %v368_v30  ;;  %v387_v40 = vadd.f32 %v377_v32, %v369_v31 }
 0x22d   :  { %vm392_vm0 = vcmp.ge.f32.partialorder %v384_v33, 0.0  ;;  %vm393_vm1 = vcmp.ge.f32.partialorder %v385_v36, 0.0  ;;  %vm394_vm2 = vcmp.ge.f32.partialorder %v386_v39, 0.0  ;;  %vm395_vm3 = vcmp.ge.f32.partialorder %v387_v40, 0.0 }
 0x22e   :  { %v400_v34 = vmul.f32 0.2, %v384_v33  ;;  %v401_v37 = vmul.f32 0.2, %v385_v36  ;;  %v402_v35 = vmul.f32 0.2, %v386_v39  ;;  %v382_v48 = vpop.permute.xlu1 %381 }
 0x22f   :  { %v403_v49 = vmul.f32 0.2, %v387_v40  ;;  %v388_v50 = vadd.f32 %v382_v48, %v370_v43  ;;  %v389_v51 = vadd.f32 %v382_v48, %v371_v44  ;;  %v390_v52 = vadd.f32 %v382_v48, %v372_v47 }
 0x230   :  { %v408_v53 = vsel %vm392_vm0, %v384_v33, %v400_v34  ;;  %v409_v41 = vsel %vm393_vm1, %v385_v36, %v401_v37  ;;  %v410_v54 = vsel %vm394_vm2, %v386_v39, %v402_v35  ;;  %v391_v45 = vadd.f32 %v382_v48, %v373_v38 }
 0x231   :  { %v411_v55 = vsel %vm395_vm3, %v387_v40, %v403_v49  ;;  %v485_v42 = vpack.c.bf16 %v409_v41, %v408_v53  ;;  %vm396_vm4 = vcmp.ge.f32.partialorder %v388_v50, 0.0  ;;  %vm397_vm5 = vcmp.ge.f32.partialorder %v389_v51, 0.0 }
 0x232   :  { %v486_v56 = vpack.c.bf16 %v411_v55, %v410_v54  ;;  %vm398_vm6 = vcmp.ge.f32.partialorder %v390_v52, 0.0  ;;  %vm399_vm7 = vcmp.ge.f32.partialorder %v391_v45, 0.0  ;;  %v404_v57 = vmul.f32 0.2, %v388_v50 }
 0x233   :  { %440 = vst [vmem:[%s746_s4] sm:$0xff] %v485_v42  ;;  %v405_v46 = vmul.f32 0.2, %v389_v51  ;;  %v406_v58 = vmul.f32 0.2, %v390_v52  ;;  %v407_v59 = vmul.f32 0.2, %v391_v45 }
 0x234   :  { %441 = vst [vmem:[%s746_s4 + $0x8] sm:$0xff] %v486_v56  ;;  %v412_v60 = vsel %vm396_vm4, %v388_v50, %v404_v57 }
 0x235   :  { %v413_v61 = vsel %vm397_vm5, %v389_v51, %v405_v46  ;;  %v414_v62 = vsel %vm398_vm6, %v390_v52, %v406_v58  ;;  %v415_v63 = vsel %vm399_vm7, %v391_v45, %v407_v59 }
 0x236   :  { %v487_v0 = vpack.c.bf16 %v413_v61, %v412_v60  ;;  %v488_v1 = vpack.c.bf16 %v415_v63, %v414_v62 }
 0x238   :  { %442 = vst [vmem:[%s746_s4 + $0x10] sm:$0xff] %v487_v0  ;;  %443 = vst [vmem:[%s746_s4 + $0x18] sm:$0xff] %v488_v1 }

// kernel: discriminator_forward.6
= control target key start
LH: loop header
LB: loop body
LE: loop exit
PB: predicated region body
PF: predicated region fallthrough
CT: control target
= control target key end

     0   :  { %v487_v36 = vmov 0   ;;  %s627_s1 = inlined_call_operand.vmem [shape: bf16[256,128], index: 1, kind: input, shape index: {}]   ;;  %s628_s0 = inlined_call_operand.vmem [shape: bf16[32,256], index: 0, kind: input, shape index: {}]   ;;  %s629_s2 = inlined_call_operand.vmem [shape: f32[32,1], index: 2, kind: input, shape index: {}]   ;;  %s630_s3 = inlined_call_operand.vmem [shape: f32[32,1], index: 3, kind: input, shape index: {}]   ;;  %s631_s4 = inlined_call_operand.vmem [shape: bf16[32,128], index: 4, kind: output, shape index: {}]  }
   0x1   :  { %v457_v0 = vld [vmem:[%s627_s1 + $0x40] sm:$0xff]   ;;  %v459_v2 = vld [vmem:[%s627_s1 + $0x48] sm:$0xff]   ;;  %v461_v4 = vld [vmem:[%s627_s1 + $0x50] sm:$0xff]   ;;  %455 = vset.pattern.permute.xlu0 %v487_v36  ;;  %456 = vset.pattern.permute.xlu1 %v487_v36 }
   0x2   :  { %v458_v1 = vld [vmem:[%s627_s1] sm:$0xff]   ;;  %410 = vmatprep.subr.bf16.mxu0 %v457_v0  ;;  %438 = vmatprep.subr.bf16.mxu1 %v457_v0  ;;  %v460_v3 = vld [vmem:[%s627_s1 + $0x8] sm:$0xff]   ;;  %v462_v5 = vld [vmem:[%s627_s1 + $0x10] sm:$0xff]  }
   0x3   :  { %411 = vmatpush3.bf16.msra.mxu0 %v458_v1  ;;  %446 = vmatpush3.bf16.msra.mxu1 %v458_v1  ;;  %v463_v6 = vld [vmem:[%s627_s1 + $0x58] sm:$0xff]   ;;  %v465_v8 = vld [vmem:[%s627_s1 + $0x60] sm:$0xff]   ;;  %v467_v10 = vld [vmem:[%s627_s1 + $0x68] sm:$0xff]  }
   0x4   :  { %412 = vmatprep.subr.bf16.mxu0 %v459_v2  ;;  %439 = vmatprep.subr.bf16.mxu1 %v459_v2  ;;  %v464_v7 = vld [vmem:[%s627_s1 + $0x18] sm:$0xff]   ;;  %v466_v9 = vld [vmem:[%s627_s1 + $0x20] sm:$0xff]   ;;  %v468_v13 = vld [vmem:[%s627_s1 + $0x28] sm:$0xff]  }
   0x5   :  { %v475_v11 = vld [vmem:[%s628_s0 + $0x4] ss:$8 sps:$4 sm:$0xff]   ;;  %v478_v12 = vld [vmem:[%s628_s0 + $0x14] ss:$8 sps:$4 sm:$0xff]   ;;  %v473_v18 = vld [vmem:[%s628_s0] ss:$8 sps:$4 sm:$0xff]  }
   0x6   :  { %v469_v14 = vld [vmem:[%s627_s1 + $0x70] sm:$0xff]   ;;  %202 = vmatprep.mubr.bf16.mxu0 %v475_v11  ;;  %210 = vmatprep.mubr.bf16.mxu1 %v478_v12  ;;  %v471_v16 = vld [vmem:[%s627_s1 + $0x78] sm:$0xff]   ;;  %v260_v12 = vld [vmem:[%s629_s2 + $0x8] sm:$0xff] }
   0x7   :  { %413 = vmatpush3.bf16.msra.mxu0 %v460_v3  ;;  %447 = vmatpush3.bf16.msra.mxu1 %v460_v3  ;;  %v470_v15 = vld [vmem:[%s627_s1 + $0x30] sm:$0xff]   ;;  %v472_v17 = vld [vmem:[%s627_s1 + $0x38] sm:$0xff]  }
   0x8   :  { %414 = vmatprep.subr.bf16.mxu0 %v461_v4  ;;  %440 = vmatprep.subr.bf16.mxu1 %v461_v4  ;;  %v476_v19 = vld [vmem:[%s628_s0 + $0x10] ss:$8 sps:$4 sm:$0xff]  }
   0xb   :  { %415 = vmatpush3.bf16.msra.mxu0 %v462_v5  ;;  %448 = vmatpush3.bf16.msra.mxu1 %v462_v5  ;;  %v259_v5 = vld [vmem:[%s629_s2] sm:$0xff] }
   0xc   :  { %416 = vmatprep.subr.bf16.mxu0 %v463_v6  ;;  %441 = vmatprep.subr.bf16.mxu1 %v463_v6 }
   0xf   :  { %417 = vmatpush3.bf16.msra.mxu0 %v464_v7  ;;  %449 = vmatpush3.bf16.msra.mxu1 %v464_v7 }
  0x10   :  { %418 = vmatprep.subr.bf16.mxu0 %v465_v8  ;;  %442 = vmatprep.subr.bf16.mxu1 %v465_v8  ;;  %v261_v8 = vld [vmem:[%s629_s2 + $0x10] sm:$0xff] }
  0x13   :  { %419 = vmatpush3.bf16.msra.mxu0 %v466_v9  ;;  %450 = vmatpush3.bf16.msra.mxu1 %v466_v9 }
  0x14   :  { %420 = vmatprep.subr.bf16.mxu0 %v467_v10  ;;  %443 = vmatprep.subr.bf16.mxu1 %v467_v10 }
  0x17   :  { %421 = vmatpush3.bf16.msra.mxu0 %v468_v13  ;;  %451 = vmatpush3.bf16.msra.mxu1 %v468_v13 }
  0x18   :  { %422 = vmatprep.subr.bf16.mxu0 %v469_v14  ;;  %444 = vmatprep.subr.bf16.mxu1 %v469_v14 }
  0x1b   :  { %423 = vmatpush3.bf16.msra.mxu0 %v470_v15  ;;  %452 = vmatpush3.bf16.msra.mxu1 %v470_v15  ;;  %v262_v15 = vld [vmem:[%s629_s2 + $0x18] sm:$0xff] }
  0x1c   :  { %424 = vmatprep.subr.bf16.mxu0 %v471_v16  ;;  %445 = vmatprep.subr.bf16.mxu1 %v471_v16 }
  0x1f   :  { %425 = vmatpush3.bf16.msra.mxu0 %v472_v17  ;;  %453 = vmatpush3.bf16.msra.mxu1 %v472_v17 }
  0x22   :  { %203 = vmatmul.mubr.bf16.vlgmr.msra.gmra.mrb[0].mxu0 %v473_v18  ;;  %211 = vmatmul.mubr.bf16.vlgmr.msra.gmra.mrb[0].mxu1 %v476_v19  ;;  %v275_v18 = vld [vmem:[%s630_s3] sm:$0xff] }
  0xf5   :  { %v426_v20 = vpop.f32.mrb[0].mxu0  ;;  %v432_v21 = vpop.f32.mrb[0].mxu1 }
  0xf6   :  { %v427_v22 = vpop.f32.mrb[1].mxu0  ;;  %v433_v23 = vpop.f32.mrb[1].mxu1 }
  0xf7   :  { %v573_v24 = vadd.f32 %v427_v22, %v426_v20  ;;  %v575_v25 = vadd.f32 %v433_v23, %v432_v21  ;;  %v429_v26 = vpop.f32.mrb[2].mxu0  ;;  %v435_v27 = vpop.f32.mrb[2].mxu1  ;;  %v277_v21 = vld [vmem:[%s630_s3 + $0x10] sm:$0xff] }
  0xf8   :  { %v430_v28 = vpop.f32.mrb[3].mxu0  ;;  %v436_v29 = vpop.f32.mrb[3].mxu1 }
  0xf9   :  { %v577_v30 = vadd.f32 %v430_v28, %v429_v26  ;;  %227 = vadd.xlane.f32.xlu1 %v575_v25  ;;  %223 = vadd.xlane.f32.xlu0 %v573_v24  ;;  %v581_v31 = vadd.f32 %v436_v29, %v435_v27  ;;  %v219_v33 = vmul.f32 %v573_v24, %v573_v24  ;;  %v276_v26 = vld [vmem:[%s630_s3 + $0x8] sm:$0xff]  ;;  %v278_v29 = vld [vmem:[%s630_s3 + $0x18] sm:$0xff] }
  0xfa   :  { %v221_v35 = vmul.f32 %v575_v25, %v575_v25 }
  0xfb   :  { %v220_v32 = vmul.f32 %v577_v30, %v577_v30  ;;  %v222_v34 = vmul.f32 %v581_v31, %v581_v31 }
  0xfd   :  { %229 = vadd.xlane.f32.xlu1 %v581_v31  ;;  %225 = vadd.xlane.f32.xlu0 %v577_v30 }
 0x101   :  { %233 = vadd.xlane.f32.xlu1 %v220_v32  ;;  %231 = vadd.xlane.f32.xlu0 %v219_v33 }
 0x105   :  { %237 = vadd.xlane.f32.xlu1 %v222_v34  ;;  %235 = vadd.xlane.f32.xlu0 %v221_v35 }
 0x186   :  { %v228_v37 = vpop.xlane.xlu1 %227  ;;  %v224_v38 = vpop.xlane.xlu0 %223 }
 0x187   :  { %v239_v41 = vmul.f32 0.0078125, %v224_v38  ;;  %v241_v45 = vmul.f32 0.0078125, %v228_v37 }
 0x189   :  { %v247_v46 = vmul.f32 %v239_v41, %v239_v41  ;;  %v249_v55 = vmul.f32 %v241_v45, %v241_v45 }
 0x18a   :  { %v230_v39 = vpop.xlane.xlu1 %229  ;;  %v226_v40 = vpop.xlane.xlu0 %225 }
 0x18b   :  { %v240_v42 = vmul.f32 0.0078125, %v226_v40  ;;  %v242_v49 = vmul.f32 0.0078125, %v230_v39 }
 0x18d   :  { %v248_v50 = vmul.f32 %v240_v42, %v240_v42  ;;  %v250_v59 = vmul.f32 %v242_v49, %v242_v49 }
 0x18e   :  { %v234_v43 = vpop.xlane.xlu1 %233  ;;  %v232_v44 = vpop.xlane.xlu0 %231 }
 0x18f   :  { %v244_v47 = vmul.f32 0.0078125, %v234_v43  ;;  %v243_v48 = vmul.f32 0.0078125, %v232_v44 }
 0x191   :  { %v251_v51 = vsub.f32 %v243_v48, %v247_v46  ;;  %v252_v52 = vsub.f32 %v244_v47, %v248_v50 }
 0x192   :  { %v238_v53 = vpop.xlane.xlu1 %237  ;;  %v236_v54 = vpop.xlane.xlu0 %235 }
 0x193   :  { %v255_v56 = vmax.f32 %v251_v51, 0.0  ;;  %v246_v57 = vmul.f32 0.0078125, %v238_v53  ;;  %v245_v58 = vmul.f32 0.0078125, %v236_v54  ;;  %v256_v62 = vmax.f32 %v252_v52, 0.0 }
 0x195   :  { %v263_v60 = vadd.f32 1e-05, %v255_v56  ;;  %v253_v61 = vsub.f32 %v245_v58, %v249_v55  ;;  %v254_v63 = vsub.f32 %v246_v57, %v250_v59  ;;  %v264_v2 = vadd.f32 1e-05, %v256_v62 }
 0x197   :  { %v257_v0 = vmax.f32 %v253_v61, 0.0  ;;  %479 = vrsqrt.f32 %v263_v60  ;;  %v258_v3 = vmax.f32 %v254_v63, 0.0 }
 0x199   :  { %v265_v1 = vadd.f32 1e-05, %v257_v0  ;;  %v266_v4 = vadd.f32 1e-05, %v258_v3 }
 0x19b   :  { %481 = vrsqrt.f32 %v265_v1 }
 0x19c   :  { %483 = vrsqrt.f32 %v264_v2 }
 0x19d   :  { %485 = vrsqrt.f32 %v266_v4 }
 0x1a1   :  { %v480_v6 = vpop.eup %479 }
 0x1a2   :  { %v271_v7 = vmul.f32 %v480_v6, %v259_v5 }
 0x1a4   :  { %289 = vperm.xlu0 %455, %v271_v7   ;;  %v279_v17 = vmul.f32 %v271_v7, %v239_v41 }
 0x1a5   :  { %v482_v9 = vpop.eup %481 }
 0x1a6   :  { %v273_v10 = vmul.f32 %v482_v9, %v261_v8  ;;  %v484_v11 = vpop.eup %483  ;;  %v283_v19 = vsub.f32 %v275_v18, %v279_v17 }
 0x1a7   :  { %v272_v13 = vmul.f32 %v484_v11, %v260_v12  ;;  %v486_v14 = vpop.eup %485 }
 0x1a8   :  { %299 = vperm.xlu1 %456, %v273_v10   ;;  %v274_v16 = vmul.f32 %v486_v14, %v262_v15  ;;  %v281_v20 = vmul.f32 %v273_v10, %v241_v45 }
 0x1a9   :  { %v280_v23 = vmul.f32 %v272_v13, %v240_v42 }
 0x1aa   :  { %v285_v22 = vsub.f32 %v277_v21, %v281_v20  ;;  %v282_v28 = vmul.f32 %v274_v16, %v242_v49 }
 0x1ab   :  { %v284_v27 = vsub.f32 %v276_v26, %v280_v23 }
 0x1ac   :  { %294 = vperm.xlu1 %456, %v272_v13   ;;  %v286_v32 = vsub.f32 %v278_v29, %v282_v28 }
 0x1b0   :  { %304 = vperm.xlu1 %456, %v274_v16  }
 0x1b4   :  { %313 = vperm.xlu1 %456, %v283_v19  }
 0x1b8   :  { %323 = vperm.xlu1 %456, %v285_v22  }
 0x1bc   :  { %318 = vperm.xlu1 %456, %v284_v27  }
 0x1c0   :  { %328 = vperm.xlu1 %456, %v286_v32  }
 0x223   :  { %v290_v36 = vpop.permute.xlu0 %289 }
 0x224   :  { %v307_v38 = vmul.f32 %v573_v24, %v290_v36 }
 0x227   :  { %v300_v33 = vpop.permute.xlu1 %299 }
 0x228   :  { %v309_v41 = vmul.f32 %v575_v25, %v300_v33 }
 0x22b   :  { %v295_v34 = vpop.permute.xlu1 %294 }
 0x22c   :  { %v308_v42 = vmul.f32 %v577_v30, %v295_v34 }
 0x22f   :  { %v305_v35 = vpop.permute.xlu1 %304 }
 0x230   :  { %v310_v47 = vmul.f32 %v581_v31, %v305_v35 }
 0x233   :  { %v314_v37 = vpop.permute.xlu1 %313 }
 0x234   :  { %v331_v40 = vadd.f32 %v314_v37, %v307_v38 }
 0x236   :  { %v339_v44 = vmul.f32 0.2, %v331_v40  ;;  %vm335_vm0 = vcmp.ge.f32.partialorder %v331_v40, 0.0 }
 0x237   :  { %v324_v39 = vpop.permute.xlu1 %323 }
 0x238   :  { %v333_v45 = vadd.f32 %v324_v39, %v309_v41  ;;  %v343_v50 = vsel %vm335_vm0, %v331_v40, %v339_v44 }
 0x23a   :  { %v341_v51 = vmul.f32 0.2, %v333_v45  ;;  %vm337_vm2 = vcmp.ge.f32.partialorder %v333_v45, 0.0 }
 0x23b   :  { %v319_v43 = vpop.permute.xlu1 %318 }
 0x23c   :  { %v332_v46 = vadd.f32 %v319_v43, %v308_v42  ;;  %v345_v30 = vsel %vm337_vm2, %v333_v45, %v341_v51 }
 0x23e   :  { %vm336_vm1 = vcmp.ge.f32.partialorder %v332_v46, 0.0  ;;  %v340_v48 = vmul.f32 0.2, %v332_v46 }
 0x23f   :  { %v329_v49 = vpop.permute.xlu1 %328 }
 0x240   :  { %v344_v52 = vsel %vm336_vm1, %v332_v46, %v340_v48  ;;  %v334_v24 = vadd.f32 %v329_v49, %v310_v47 }
 0x241   :  { %v402_v53 = vpack.c.bf16 %v344_v52, %v343_v50 }
 0x242   :  { %vm338_vm3 = vcmp.ge.f32.partialorder %v334_v24, 0.0  ;;  %v342_v25 = vmul.f32 0.2, %v334_v24 }
 0x243   :  { %403 = vst [vmem:[%s631_s4] sm:$0xff] %v402_v53  }
 0x244   :  { %v346_v54 = vsel %vm338_vm3, %v334_v24, %v342_v25 }
 0x245   :  { %v407_v55 = vpack.c.bf16 %v346_v54, %v345_v30 }
 0x247   :  { %409 = vst [vmem:[%s631_s4 + $0x8] sm:$0xff] %v407_v55  }

// kernel: discriminator_forward.7
= control target key start
LH: loop header
LB: loop body
LE: loop exit
PB: predicated region body
PF: predicated region fallthrough
CT: control target
= control target key end

     0   :  { %s1672_s0 = inlined_call_operand.vmem [shape: bf16[64,512], index: 0, kind: input, shape index: {}]   ;;  %s1673_s1 = inlined_call_operand.vmem [shape: bf16[512,32], index: 1, kind: input, shape index: {}]   ;;  %s1674_s2 = inlined_call_operand.vmem [shape: f32[64,1], index: 2, kind: input, shape index: {}]   ;;  %s1675_s3 = inlined_call_operand.vmem [shape: f32[64,1], index: 3, kind: input, shape index: {}]   ;;  %s1676_s4 = inlined_call_operand.vmem [shape: f32[64,16], index: 4, kind: input, shape index: {}]   ;;  %s1677_s5 = inlined_call_operand.hbm [shape: f32[1,2], index: 5, kind: output, shape index: {}]  }
   0x1   :  { %v1151_v0 = vld [vmem:[%s1673_s1 + $0x40] sm:$0xff]   ;;  %v1155_v4 = vld [vmem:[%s1673_s1 + $0x48] sm:$0xff]   ;;  %v1159_v8 = vld [vmem:[%s1673_s1 + $0x50] sm:$0xff]  }
   0x2   :  { %v1152_v1 = vld [vmem:[%s1673_s1 + $0xc0] sm:$0xff]   ;;  %1043 = vmatprep.subr.bf16.mxu0 %v1151_v0  ;;  %v1156_v5 = vld [vmem:[%s1673_s1 + $0xc8] sm:$0xff]   ;;  %v1160_v9 = vld [vmem:[%s1673_s1 + $0xd0] sm:$0xff]  }
   0x3   :  { %v1153_v2 = vld [vmem:[%s1673_s1] sm:$0xff]   ;;  %1083 = vmatprep.subr.bf16.mxu1 %v1152_v1  ;;  %v1157_v6 = vld [vmem:[%s1673_s1 + $0x8] sm:$0xff]   ;;  %v1161_v10 = vld [vmem:[%s1673_s1 + $0x10] sm:$0xff]  }
   0x4   :  { %v1154_v3 = vld [vmem:[%s1673_s1 + $0x80] sm:$0xff]   ;;  %1044 = vmatpush3.bf16.msra.mxu0 %v1153_v2  ;;  %v1158_v7 = vld [vmem:[%s1673_s1 + $0x88] sm:$0xff]   ;;  %v1162_v11 = vld [vmem:[%s1673_s1 + $0x90] sm:$0xff]  }
   0x5   :  { %1084 = vmatpush3.bf16.msra.mxu1 %v1154_v3  ;;  %1045 = vmatprep.subr.bf16.mxu0 %v1155_v4  ;;  %v1163_v12 = vld [vmem:[%s1673_s1 + $0x58] sm:$0xff]   ;;  %v1167_v16 = vld [vmem:[%s1673_s1 + $0x60] sm:$0xff]   ;;  %v1171_v20 = vld [vmem:[%s1673_s1 + $0x68] sm:$0xff]  }
   0x6   :  { %1085 = vmatprep.subr.bf16.mxu1 %v1156_v5  ;;  %v1164_v13 = vld [vmem:[%s1673_s1 + $0xd8] sm:$0xff]   ;;  %v1168_v17 = vld [vmem:[%s1673_s1 + $0xe0] sm:$0xff]   ;;  %v1172_v21 = vld [vmem:[%s1673_s1 + $0xe8] sm:$0xff]  }
   0x7   :  { %v1165_v14 = vld [vmem:[%s1673_s1 + $0x18] sm:$0xff]   ;;  %v1169_v18 = vld [vmem:[%s1673_s1 + $0x20] sm:$0xff]   ;;  %v1173_v22 = vld [vmem:[%s1673_s1 + $0x28] sm:$0xff]  }
   0x8   :  { %1046 = vmatpush3.bf16.msra.mxu0 %v1157_v6  ;;  %v1166_v15 = vld [vmem:[%s1673_s1 + $0x98] sm:$0xff]   ;;  %v1170_v19 = vld [vmem:[%s1673_s1 + $0xa0] sm:$0xff]   ;;  %v1174_v23 = vld [vmem:[%s1673_s1 + $0xa8] sm:$0xff]  }
   0x9   :  { %1086 = vmatpush3.bf16.msra.mxu1 %v1158_v7  ;;  %1047 = vmatprep.subr.bf16.mxu0 %v1159_v8  ;;  %v1175_v24 = vld [vmem:[%s1673_s1 + $0x70] sm:$0xff]   ;;  %v1179_v28 = vld [vmem:[%s1673_s1 + $0x78] sm:$0xff]  }
   0xa   :  { %1087 = vmatprep.subr.bf16.mxu1 %v1160_v9  ;;  %v1176_v25 = vld [vmem:[%s1673_s1 + $0xf0] sm:$0xff]   ;;  %v1180_v29 = vld [vmem:[%s1673_s1 + $0xf8] sm:$0xff]  }
   0xb   :  { %v1177_v26 = vld [vmem:[%s1673_s1 + $0x30] sm:$0xff]   ;;  %v1181_v30 = vld [vmem:[%s1673_s1 + $0x38] sm:$0xff]  }
   0xc   :  { %1048 = vmatpush3.bf16.msra.mxu0 %v1161_v10  ;;  %v1178_v27 = vld [vmem:[%s1673_s1 + $0xb0] sm:$0xff]   ;;  %v1182_v31 = vld [vmem:[%s1673_s1 + $0xb8] sm:$0xff]  }
   0xd   :  { %1088 = vmatpush3.bf16.msra.mxu1 %v1162_v11  ;;  %1049 = vmatprep.subr.bf16.mxu0 %v1163_v12  ;;  %v1183_v32 = vld [vmem:[%s1672_s0] ss:$16 sps:$4 sm:$0xff]   ;;  %v1185_v33 = vld [vmem:[%s1672_s0 + $0x4] ss:$16 sps:$4 sm:$0xff]   ;;  %v1186_v34 = vld [vmem:[%s1672_s0 + $0x8] ss:$16 sps:$4 sm:$0xff]  }
   0xe   :  { %1089 = vmatprep.subr.bf16.mxu1 %v1164_v13  ;;  %v1188_v35 = vld [vmem:[%s1672_s0 + $0xc] ss:$16 sps:$4 sm:$0xff]   ;;  %406 = vmatprep.mubr.bf16.mxu0 %v1185_v33  ;;  %v1189_v36 = vld [vmem:[%s1672_s0 + $0x24] ss:$16 sps:$4 sm:$0xff]   ;;  %v1193_v38 = vld [vmem:[%s1672_s0 + $0x20] ss:$16 sps:$4 sm:$0xff]  }
   0xf   :  { %471 = vmatprep.mubr.bf16.mxu1 %v1188_v35  ;;  %v1191_v37 = vld [vmem:[%s1672_s0 + $0x2c] ss:$16 sps:$4 sm:$0xff]   ;;  %v1194_v39 = vld [vmem:[%s1672_s0 + $0x28] ss:$16 sps:$4 sm:$0xff]   ;;  %v1195_v40 = vld [vmem:[%s1672_s0 + $0x44] ss:$16 sps:$4 sm:$0xff]  }
  0x10   :  { %1050 = vmatpush3.bf16.msra.mxu0 %v1165_v14  ;;  %v1197_v41 = vld [vmem:[%s1672_s0 + $0x4c] ss:$16 sps:$4 sm:$0xff]  }
  0x11   :  { %1090 = vmatpush3.bf16.msra.mxu1 %v1166_v15  ;;  %1051 = vmatprep.subr.bf16.mxu0 %v1167_v16 }
  0x12   :  { %1091 = vmatprep.subr.bf16.mxu1 %v1168_v17 }
  0x14   :  { %1052 = vmatpush3.bf16.msra.mxu0 %v1169_v18 }
  0x15   :  { %1092 = vmatpush3.bf16.msra.mxu1 %v1170_v19  ;;  %1053 = vmatprep.subr.bf16.mxu0 %v1171_v20 }
  0x16   :  { %1093 = vmatprep.subr.bf16.mxu1 %v1172_v21 }
  0x18   :  { %1054 = vmatpush3.bf16.msra.mxu0 %v1173_v22 }
  0x19   :  { %1094 = vmatpush3.bf16.msra.mxu1 %v1174_v23  ;;  %1055 = vmatprep.subr.bf16.mxu0 %v1175_v24 }
  0x1a   :  { %1095 = vmatprep.subr.bf16.mxu1 %v1176_v25 }
  0x1c   :  { %1056 = vmatpush3.bf16.msra.mxu0 %v1177_v26 }
  0x1d   :  { %1096 = vmatpush3.bf16.msra.mxu1 %v1178_v27  ;;  %1057 = vmatprep.subr.bf16.mxu0 %v1179_v28 }
  0x1e   :  { %1097 = vmatprep.subr.bf16.mxu1 %v1180_v29 }
  0x20   :  { %1058 = vmatpush3.bf16.msra.mxu0 %v1181_v30 }
  0x21   :  { %1098 = vmatpush3.bf16.msra.mxu1 %v1182_v31 }
  0x23   :  { %407 = vmatmul.mubr.bf16.vlgmr.msra.gmra.mrb[0].mxu0 %v1183_v32 }
  0x24   :  { %472 = vmatmul.mubr.bf16.vlgmr.msra.gmra.mrb[0].mxu1 %v1186_v34  ;;  %414 = vmatprep.mubr.bf16.mxu0 %v1189_v36 }
  0x25   :  { %479 = vmatprep.mubr.bf16.mxu1 %v1191_v37 }
  0x26   :  { %10 = vsyncpa [#allocation3], 0  ;;  %v1199_v42 = vld [vmem:[%s1672_s0 + $0x40] ss:$16 sps:$4 sm:$0xff]   ;;  %v1200_v43 = vld [vmem:[%s1672_s0 + $0x48] ss:$16 sps:$4 sm:$0xff]  }
  0x27   :  { %v1201_v44 = vld [vmem:[%s1672_s0 + $0x64] ss:$16 sps:$4 sm:$0xff]   ;;  %v1203_v45 = vld [vmem:[%s1672_s0 + $0x6c] ss:$16 sps:$4 sm:$0xff]   ;;  %v1205_v46 = vld [vmem:[%s1672_s0 + $0x60] ss:$16 sps:$4 sm:$0xff]  }
  0x28   :  { %v1206_v47 = vld [vmem:[%s1672_s0 + $0x68] ss:$16 sps:$4 sm:$0xff]   ;;  %vm512_vm0 = vcmask 261120   ;;  %s1252_s15 = smov 16  }
  0x2b   :  { %415 = vmatmul.mubr.bf16.gmra.mrb[4].mxu0 %v1193_v38 }
  0x2c   :  { %480 = vmatmul.mubr.bf16.gmra.mrb[4].mxu1 %v1194_v39  ;;  %422 = vmatprep.mubr.bf16.mxu0 %v1195_v40 }
  0x2d   :  { %487 = vmatprep.mubr.bf16.mxu1 %v1197_v41 }
  0x33   :  { %423 = vmatmul.mubr.bf16.gmra.mrb[8].mxu0 %v1199_v42 }
  0x34   :  { %488 = vmatmul.mubr.bf16.gmra.mrb[8].mxu1 %v1200_v43  ;;  %430 = vmatprep.mubr.bf16.mxu0 %v1201_v44 }
  0x35   :  { %495 = vmatprep.mubr.bf16.mxu1 %v1203_v45 }
  0x3b   :  { %431 = vmatmul.mubr.bf16.gmra.mrb[12].mxu0 %v1205_v46 }
  0x3c   :  { %496 = vmatmul.mubr.bf16.gmra.mrb[12].mxu1 %v1206_v47 }
  0xf6   :  { %v1059_v48 = vpop.f32.mrb[0].mxu0 }
  0xf7   :  { %v1099_v49 = vpop.f32.mrb[0].mxu1  ;;  %v1060_v50 = vpop.f32.mrb[1].mxu0 }
  0xf8   :  { %v1061_v51 = vadd.f32 %v1060_v50, %v1059_v48  ;;  %v1100_v52 = vpop.f32.mrb[1].mxu1  ;;  %v1062_v53 = vpop.f32.mrb[2].mxu0 }
  0xf9   :  { %v1101_v54 = vadd.f32 %v1100_v52, %v1099_v49  ;;  %v1102_v55 = vpop.f32.mrb[2].mxu1  ;;  %v1063_v56 = vpop.f32.mrb[3].mxu0 }
  0xfa   :  { %v1064_v57 = vadd.f32 %v1063_v56, %v1062_v53  ;;  %v1103_v58 = vpop.f32.mrb[3].mxu1 }
  0xfb   :  { %v1429_v59 = vadd.f32 %v1101_v54, %v1061_v51  ;;  %v1104_v60 = vadd.f32 %v1103_v58, %v1102_v55 }
  0xfd   :  { %v1431_v61 = vadd.f32 %v1104_v60, %v1064_v57  ;;  %v513_v62 = vsel %vm512_vm0, %v1429_v59, 0.0  ;;  %v504_v11 = vmul.f32 %v1429_v59, %v1429_v59 }
  0xfe   :  { %514 = vadd.xlane.f32.xlu0 %v513_v62  ;;  %v1065_v63 = vpop.f32.mrb[4].mxu0 }
  0xff   :  { %v1105_v0 = vpop.f32.mrb[4].mxu1  ;;  %v1066_v1 = vpop.f32.mrb[5].mxu0  ;;  %v505_v2 = vmul.f32 %v1431_v61, %v1431_v61  ;;  %v516_v8 = vsel %vm512_vm0, %v1431_v61, 0.0  ;;  %v537_v18 = vsel %vm512_vm0, %v504_v11, 0.0 }
 0x100   :  { %v1067_v3 = vadd.f32 %v1066_v1, %v1065_v63  ;;  %v1106_v4 = vpop.f32.mrb[5].mxu1  ;;  %v1068_v5 = vpop.f32.mrb[6].mxu0 }
 0x101   :  { %v1107_v6 = vadd.f32 %v1106_v4, %v1105_v0  ;;  %v540_v7 = vsel %vm512_vm0, %v505_v2, 0.0  ;;  %v1108_v9 = vpop.f32.mrb[6].mxu1  ;;  %v1069_v10 = vpop.f32.mrb[7].mxu0  ;;  %v1251_v2 = vmov 0   ;;  %v1493_v4 = vld [vmem:[%s1676_s4 + $0x8] sm:$0xff] }
 0x102   :  { %541 = vadd.xlane.f32.xlu1 %v540_v7  ;;  %517 = vadd.xlane.f32.xlu0 %v516_v8  ;;  %v1070_v12 = vadd.f32 %v1069_v10, %v1068_v5  ;;  %v1109_v13 = vpop.f32.mrb[7].mxu1 }
 0x103   :  { %v1442_v14 = vadd.f32 %v1107_v6, %v1067_v3  ;;  %v1110_v15 = vadd.f32 %v1109_v13, %v1108_v9  ;;  %1150 = vset.pattern.permute.xlu1 %v1251_v2  ;;  %1149 = vset.pattern.permute.xlu0 %v1251_v2  ;;  %v1488_v3 = vld [vmem:[%s1676_s4] sm:$0xff] }
 0x105   :  { %v1444_v16 = vadd.f32 %v1110_v15, %v1070_v12  ;;  %v519_v17 = vsel %vm512_vm0, %v1442_v14, 0.0  ;;  %v506_v19 = vmul.f32 %v1442_v14, %v1442_v14 }
 0x106   :  { %520 = vadd.xlane.f32.xlu1 %v519_v17  ;;  %538 = vadd.xlane.f32.xlu0 %v537_v18  ;;  %v1071_v20 = vpop.f32.mrb[8].mxu0 }
 0x107   :  { %v1111_v21 = vpop.f32.mrb[8].mxu1  ;;  %v1072_v22 = vpop.f32.mrb[9].mxu0  ;;  %v522_v23 = vsel %vm512_vm0, %v1444_v16, 0.0  ;;  %v543_v24 = vsel %vm512_vm0, %v506_v19, 0.0  ;;  %v507_v25 = vmul.f32 %v1444_v16, %v1444_v16 }
 0x108   :  { %v1073_v26 = vadd.f32 %v1072_v22, %v1071_v20  ;;  %v1112_v27 = vpop.f32.mrb[9].mxu1  ;;  %v1074_v28 = vpop.f32.mrb[10].mxu0 }
 0x109   :  { %v1113_v29 = vadd.f32 %v1112_v27, %v1111_v21  ;;  %v1114_v30 = vpop.f32.mrb[10].mxu1  ;;  %v1075_v31 = vpop.f32.mrb[11].mxu0  ;;  %v546_v36 = vsel %vm512_vm0, %v507_v25, 0.0 }
 0x10a   :  { %523 = vadd.xlane.f32.xlu1 %v522_v23  ;;  %544 = vadd.xlane.f32.xlu0 %v543_v24  ;;  %v1076_v32 = vadd.f32 %v1075_v31, %v1074_v28  ;;  %v1115_v33 = vpop.f32.mrb[11].mxu1 }
 0x10b   :  { %v1456_v34 = vadd.f32 %v1113_v29, %v1073_v26  ;;  %v1116_v35 = vadd.f32 %v1115_v33, %v1114_v30 }
 0x10d   :  { %v1459_v37 = vadd.f32 %v1116_v35, %v1076_v32  ;;  %v525_v38 = vsel %vm512_vm0, %v1456_v34, 0.0  ;;  %v508_v39 = vmul.f32 %v1456_v34, %v1456_v34 }
 0x10e   :  { %547 = vadd.xlane.f32.xlu1 %v546_v36  ;;  %526 = vadd.xlane.f32.xlu0 %v525_v38  ;;  %v1077_v40 = vpop.f32.mrb[12].mxu0 }
 0x10f   :  { %v1117_v41 = vpop.f32.mrb[12].mxu1  ;;  %v1078_v42 = vpop.f32.mrb[13].mxu0  ;;  %v528_v43 = vsel %vm512_vm0, %v1459_v37, 0.0  ;;  %v549_v44 = vsel %vm512_vm0, %v508_v39, 0.0  ;;  %v509_v45 = vmul.f32 %v1459_v37, %v1459_v37 }
 0x110   :  { %v1079_v46 = vadd.f32 %v1078_v42, %v1077_v40  ;;  %v1118_v47 = vpop.f32.mrb[13].mxu1  ;;  %v1080_v48 = vpop.f32.mrb[14].mxu0 }
 0x111   :  { %v1119_v49 = vadd.f32 %v1118_v47, %v1117_v41  ;;  %v1120_v50 = vpop.f32.mrb[14].mxu1  ;;  %v1081_v51 = vpop.f32.mrb[15].mxu0  ;;  %v552_v56 = vsel %vm512_vm0, %v509_v45, 0.0  ;;  %v602_v47 = vld [vmem:[%s1674_s2 + $0x8] sm:$0xff] }
 0x112   :  { %529 = vadd.xlane.f32.xlu1 %v528_v43  ;;  %550 = vadd.xlane.f32.xlu0 %v549_v44  ;;  %v1082_v52 = vadd.f32 %v1081_v51, %v1080_v48  ;;  %v1121_v53 = vpop.f32.mrb[15].mxu1 }
 0x113   :  { %v1470_v54 = vadd.f32 %v1119_v49, %v1079_v46  ;;  %v1122_v55 = vadd.f32 %v1121_v53, %v1120_v50  ;;  %v601_v53 = vld [vmem:[%s1674_s2] sm:$0xff] }
 0x115   :  { %v1473_v57 = vadd.f32 %v1122_v55, %v1082_v52  ;;  %v531_v58 = vsel %vm512_vm0, %v1470_v54, 0.0  ;;  %v510_v60 = vmul.f32 %v1470_v54, %v1470_v54 }
 0x116   :  { %553 = vadd.xlane.f32.xlu1 %v552_v56  ;;  %532 = vadd.xlane.f32.xlu0 %v531_v58 }
 0x117   :  { %v534_v62 = vsel %vm512_vm0, %v1473_v57, 0.0  ;;  %v555_v63 = vsel %vm512_vm0, %v510_v60, 0.0  ;;  %v511_v0 = vmul.f32 %v1473_v57, %v1473_v57 }
 0x119   :  { %v558_v1 = vsel %vm512_vm0, %v511_v0, 0.0 }
 0x11a   :  { %535 = vadd.xlane.f32.xlu1 %v534_v62  ;;  %556 = vadd.xlane.f32.xlu0 %v555_v63 }
 0x11e   :  { %559 = vadd.xlane.f32.xlu1 %v558_v1 }
 0x12f   :  { %793 = vrot.lane.b32.xlu1 %v1488_v3, %s1252_s15 }
 0x130   :  { %795 = vrot.lane.b32.xlu0 %v1493_v4, %s1252_s15 }
 0x18b   :  { %v515_v5 = vpop.xlane.xlu0 %514 }
 0x18c   :  { %v561_v8 = vmul.f32 0.03125, %v515_v5 }
 0x18e   :  { %v577_v15 = vmul.f32 %v561_v8, %v561_v8 }
 0x18f   :  { %v542_v6 = vpop.xlane.xlu1 %541  ;;  %v518_v7 = vpop.xlane.xlu0 %517 }
 0x190   :  { %v1499_v9 = vmul.f32 0.03125, %v518_v7  ;;  %v570_v10 = vmul.f32 0.03125, %v542_v6  ;;  %v633_v7 = vld [vmem:[%s1675_s3] sm:$0xff] }
 0x192   :  { %v578_v11 = vmul.f32 %v1499_v9, %v1499_v9 }
 0x193   :  { %v521_v12 = vpop.xlane.xlu1 %520  ;;  %v539_v13 = vpop.xlane.xlu0 %538 }
 0x194   :  { %v586_v17 = vsub.f32 %v570_v10, %v578_v11  ;;  %v1503_v18 = vmul.f32 0.03125, %v521_v12  ;;  %v569_v19 = vmul.f32 0.03125, %v539_v13 }
 0x196   :  { %v594_v20 = vmax.f32 %v586_v17, 0.0  ;;  %v579_v21 = vmul.f32 %v1503_v18, %v1503_v18  ;;  %v585_v22 = vsub.f32 %v569_v19, %v577_v15 }
 0x197   :  { %v524_v23 = vpop.xlane.xlu1 %523  ;;  %v545_v24 = vpop.xlane.xlu0 %544 }
 0x198   :  { %v610_v25 = vadd.f32 1e-05, %v594_v20  ;;  %v593_v26 = vmax.f32 %v585_v22, 0.0  ;;  %v1507_v27 = vmul.f32 0.03125, %v524_v23  ;;  %v571_v28 = vmul.f32 0.03125, %v545_v24  ;;  %v634_v23 = vld [vmem:[%s1675_s3 + $0x8] sm:$0xff] }
 0x19a   :  { %1207 = vrsqrt.f32 %v610_v25  ;;  %v609_v29 = vadd.f32 1e-05, %v593_v26  ;;  %v580_v30 = vmul.f32 %v1507_v27, %v1507_v27  ;;  %v587_v31 = vsub.f32 %v571_v28, %v579_v21 }
 0x19b   :  { %v548_v32 = vpop.xlane.xlu1 %547  ;;  %v527_v33 = vpop.xlane.xlu0 %526 }
 0x19c   :  { %1209 = vrsqrt.f32 %v609_v29  ;;  %v572_v35 = vmul.f32 0.03125, %v548_v32  ;;  %v595_v36 = vmax.f32 %v587_v31, 0.0  ;;  %v1511_v38 = vmul.f32 0.03125, %v527_v33  ;;  %v603_v29 = vld [vmem:[%s1674_s2 + $0x10] sm:$0xff] }
 0x19e   :  { %v588_v39 = vsub.f32 %v572_v35, %v580_v30  ;;  %v611_v43 = vadd.f32 1e-05, %v595_v36  ;;  %v581_v45 = vmul.f32 %v1511_v38, %v1511_v38  ;;  %v606_v35 = vld [vmem:[%s1674_s2 + $0x28] sm:$0xff]  ;;  %v604_v36 = vld [vmem:[%s1674_s2 + $0x18] sm:$0xff] }
 0x19f   :  { %v530_v40 = vpop.xlane.xlu1 %529  ;;  %v551_v41 = vpop.xlane.xlu0 %550 }
 0x1a0   :  { %v1513_v42 = vmul.f32 0.03125, %v530_v40  ;;  %v596_v44 = vmax.f32 %v588_v39, 0.0  ;;  %v573_v46 = vmul.f32 0.03125, %v551_v41  ;;  %1211 = vrsqrt.f32 %v611_v43 }
 0x1a2   :  { %v582_v48 = vmul.f32 %v1513_v42, %v1513_v42  ;;  %v612_v56 = vadd.f32 1e-05, %v596_v44  ;;  %v589_v58 = vsub.f32 %v573_v46, %v581_v45  ;;  %v635_v45 = vld [vmem:[%s1675_s3 + $0x10] sm:$0xff]  ;;  %v638_v46 = vld [vmem:[%s1675_s3 + $0x28] sm:$0xff] }
 0x1a3   :  { %v554_v49 = vpop.xlane.xlu1 %553  ;;  %v533_v50 = vpop.xlane.xlu0 %532 }
 0x1a4   :  { %v1208_v51 = vpop.eup %1207  ;;  %v574_v52 = vmul.f32 0.03125, %v554_v49  ;;  %v1525_v63 = vmul.f32 0.03125, %v533_v50  ;;  %1213 = vrsqrt.f32 %v612_v56  ;;  %v597_v10 = vmax.f32 %v589_v58, 0.0  ;;  %v636_v56 = vld [vmem:[%s1675_s3 + $0x18] sm:$0xff] }
 0x1a5   :  { %v626_v55 = vmul.f32 %v1208_v51, %v602_v47 }
 0x1a6   :  { %v1210_v60 = vpop.eup %1209  ;;  %v590_v62 = vsub.f32 %v574_v52, %v582_v48  ;;  %v583_v13 = vmul.f32 %v1525_v63, %v1525_v63  ;;  %v838_v48 = vlaneseq }
 0x1a7   :  { %v536_v0 = vpop.xlane.xlu1 %535  ;;  %664 = vperm.xlu1 %1150, %v626_v55   ;;  %v557_v1 = vpop.xlane.xlu0 %556  ;;  %v625_v2 = vmul.f32 %v1210_v60, %v601_v53  ;;  %v642_v19 = vmul.f32 %v626_v55, %v1499_v9  ;;  %v608_v55 = vld [vmem:[%s1674_s2 + $0x38] sm:$0xff] }
 0x1a8   :  { %v598_v5 = vmax.f32 %v590_v62, 0.0  ;;  %v1527_v6 = vmul.f32 0.03125, %v536_v0  ;;  %v575_v17 = vmul.f32 0.03125, %v557_v1  ;;  %v839_v51 = vshrl.u32 %v838_v48, 7 }
 0x1a9   :  { %659 = vperm.xlu0 %1149, %v625_v2   ;;  %v641_v11 = vmul.f32 %v625_v2, %v561_v8  ;;  %v613_v8 = vadd.f32 1e-05, %v597_v10  ;;  %v650_v28 = vsub.f32 %v634_v23, %v642_v19  ;;  %v844_v52 = vand.u32 127, %v838_v48  ;;  %v637_v10 = vld [vmem:[%s1675_s3 + $0x20] sm:$0xff] }
 0x1aa   :  { %v614_v12 = vadd.f32 1e-05, %v598_v5  ;;  %v584_v15 = vmul.f32 %v1527_v6, %v1527_v6  ;;  %v591_v24 = vsub.f32 %v575_v17, %v583_v13  ;;  %v1212_v26 = vpop.eup %1211  ;;  %v840_v58 = vadd.s32 8, %v839_v51  ;;  %v1570_v5 = vld [vmem:[%s1676_s4 + $0x18] sm:$0xff] }
 0x1ab   :  { %v560_v20 = vpop.xlane.xlu1 %559  ;;  %v649_v21 = vsub.f32 %v633_v7, %v641_v11  ;;  %v627_v32 = vmul.f32 %v1212_v26, %v603_v29  ;;  %v845_v60 = vmul.u32 16, %v844_v52  ;;  %v640_v13 = vld [vmem:[%s1675_s3 + $0x38] sm:$0xff]  ;;  %v842_v23 = vadd.s32 24, %v839_v51  ;;  %v1613_v26 = vld [vmem:[%s1676_s4 + $0x20] sm:$0xff]  ;;  %v796_v29 = vpop.permute.xlu0 %795 }
 0x1ac   :  { %1215 = vrsqrt.f32 %v614_v12  ;;  %v576_v22 = vmul.f32 0.03125, %v560_v20  ;;  %v599_v9 = vmax.f32 %v591_v24, 0.0  ;;  %v1588_v20 = vld [vmem:[%s1676_s4 + $0x28] sm:$0xff]  ;;  %v1599_v24 = vld [vmem:[%s1676_s4 + $0x38] sm:$0xff] }
 0x1ad   :  { %707 = vperm.xlu1 %1150, %v649_v21   ;;  %1217 = vrsqrt.f32 %v613_v8  ;;  %v643_v41 = vmul.f32 %v627_v32, %v1503_v18  ;;  %vm846_vm1 = vcmp.ge.s32.totalorder %v839_v51, %v845_v60  ;;  %v850_v2 = vadd.s32 16, %v845_v60  ;;  %v639_v8 = vld [vmem:[%s1675_s3 + $0x30] sm:$0xff] }
 0x1ae   :  { %v592_v25 = vsub.f32 %v576_v22, %v584_v15  ;;  %v1214_v33 = vpop.eup %1213  ;;  %v615_v40 = vadd.f32 1e-05, %v599_v9  ;;  %vm847_vm2 = vcmp.ge.s32.totalorder %v840_v58, %v845_v60  ;;  %v607_v15 = vld [vmem:[%s1674_s2 + $0x30] sm:$0xff]  ;;  %v841_v22 = vadd.s32 16, %v839_v51 }
 0x1af   :  { %v628_v44 = vmul.f32 %v1214_v33, %v604_v36  ;;  %v651_v49 = vsub.f32 %v635_v45, %v643_v41  ;;  %vm851_vm3 = vcmp.lt.s32.totalorder %v839_v51, %v850_v2  ;;  %vm852_vm4 = vcmp.lt.s32.totalorder %v840_v58, %v850_v2 }
 0x1b0   :  { %v600_v30 = vmax.f32 %v592_v25, 0.0  ;;  %vm855_vm5 = vmand %vm846_vm1, %vm851_vm3  ;;  %vm848_vm8 = vcmp.ge.s32.totalorder %v841_v22, %v845_v60  ;;  %vm849_vm9 = vcmp.ge.s32.totalorder %v842_v23, %v845_v60  ;;  %vm853_vm10 = vcmp.lt.s32.totalorder %v841_v22, %v850_v2  ;;  %v1606_v25 = vld [vmem:[%s1676_s4 + $0x10] sm:$0xff] }
 0x1b1   :  { %712 = vperm.xlu1 %1150, %v650_v28   ;;  %v644_v18 = vmul.f32 %v628_v44, %v1507_v27  ;;  %vm856_vm6 = vmand %vm847_vm2, %vm852_vm4  ;;  %vm854_vm11 = vcmp.lt.s32.totalorder %v842_v23, %v850_v2  ;;  %v1620_v28 = vld [vmem:[%s1676_s4 + $0x30] sm:$0xff]  ;;  %vm817_vm1 = vcmask 130048   ;;  %s1254_s4 = smov [#allocation2]  }
 0x1b2   :  { %v616_v31 = vadd.f32 1e-05, %v600_v30  ;;  %vm1034_vm7 = vmpackc.low %vm856_vm6, %vm855_vm5  ;;  %v794_v30 = vpop.permute.xlu1 %793 }
 0x1b3   :  { %v652_v0 = vsub.f32 %v636_v56, %v644_v18  ;;  %vm857_vm12 = vmand %vm848_vm8, %vm853_vm10 }
 0x1b4   :  { %1219 = vrsqrt.f32 %v616_v31  ;;  %vm858_vm13 = vmand %vm849_vm9, %vm854_vm11  ;;  %vm942_vm9 = vcmask 15360  }
 0x1b5   :  { %669 = vperm.xlu1 %1150, %v627_v32   ;;  %1221 = vrsqrt.f32 %v615_v40  ;;  %vm1036_vm14 = vmpackc.low %vm858_vm13, %vm857_vm12 }
 0x1b6   :  { %v1216_v39 = vpop.eup %1215 }
 0x1b7   :  { %v630_v43 = vmul.f32 %v1216_v39, %v606_v35  ;;  %v1218_v53 = vpop.eup %1217 }
 0x1b9   :  { %684 = vperm.xlu0 %1149, %v630_v43   ;;  %674 = vperm.xlu1 %1150, %v628_v44   ;;  %v646_v47 = vmul.f32 %v630_v43, %v1513_v42  ;;  %v605_v42 = vld [vmem:[%s1674_s2 + $0x20] sm:$0xff] }
 0x1ba   :  { %v629_v1 = vmul.f32 %v1218_v53, %v605_v42 }
 0x1bb   :  { %v654_v50 = vsub.f32 %v638_v46, %v646_v47  ;;  %v818_v46 = vsel %vm817_vm1, %v1488_v3, %v794_v30  ;;  %v819_v47 = vsel %vm817_vm1, %v1493_v4, %v796_v29 }
 0x1bc   :  { %v645_v11 = vmul.f32 %v629_v1, %v1511_v38 }
 0x1bd   :  { %732 = vperm.xlu0 %1149, %v654_v50   ;;  %717 = vperm.xlu1 %1150, %v651_v49  }
 0x1be   :  { %v1220_v27 = vpop.eup %1219  ;;  %v653_v17 = vsub.f32 %v637_v10, %v645_v11 }
 0x1bf   :  { %v632_v62 = vmul.f32 %v1220_v27, %v608_v55  ;;  %v1222_v12 = vpop.eup %1221 }
 0x1c0   :  { %v631_v19 = vmul.f32 %v1222_v12, %v607_v15 }
 0x1c1   :  { %694 = vperm.xlu0 %1149, %v632_v62   ;;  %722 = vperm.xlu1 %1150, %v652_v0   ;;  %v648_v7 = vmul.f32 %v632_v62, %v1527_v6  ;;  %v1253_v6 = vmov 1.0|1.0  }
 0x1c2   :  { %1129 = vmatprep.subr.msk.bf16.mxu0 %vm1034_vm7, %v1253_v6  ;;  %1141 = vmatprep.subr.msk.bf16.mxu1 %vm1034_vm7, %v1253_v6  ;;  %v647_v21 = vmul.f32 %v631_v19, %v1525_v63 }
 0x1c3   :  { %v656_v38 = vsub.f32 %v640_v13, %v648_v7  ;;  %1130 = vmatpush3.bf16.msk.msra.mxu0 %vm1034_vm7, %v1253_v6  ;;  %1143 = vmatpush3.bf16.msk.msra.mxu1 %vm1034_vm7, %v1253_v6 }
 0x1c4   :  { %v655_v63 = vsub.f32 %v639_v8, %v647_v21  ;;  %1131 = vmatprep.subr.msk.bf16.mxu0 %vm1036_vm14, %v1253_v6  ;;  %1142 = vmatprep.subr.msk.bf16.mxu1 %vm1036_vm14, %v1253_v6 }
 0x1c5   :  { %799 = vrot.lane.b32.xlu0 %v1570_v5, %s1252_s15  ;;  %679 = vperm.xlu1 %1150, %v629_v1  }
 0x1c7   :  { %1132 = vmatpush3.bf16.msk.msra.mxu0 %vm1036_vm14, %v1253_v6  ;;  %1144 = vmatpush3.bf16.msk.msra.mxu1 %vm1036_vm14, %v1253_v6 }
 0x1c9   :  { %742 = vperm.xlu0 %1149, %v656_v38   ;;  %727 = vperm.xlu1 %1150, %v653_v17  }
 0x1cd   :  { %689 = vperm.xlu1 %1150, %v631_v19   ;;  %803 = vrot.lane.b32.xlu0 %v1588_v20, %s1252_s15 }
 0x1d1   :  { %737 = vperm.xlu1 %1150, %v655_v63   ;;  %807 = vrot.lane.b32.xlu0 %v1599_v24, %s1252_s15 }
 0x1d5   :  { %797 = vrot.lane.b32.xlu1 %v1606_v25, %s1252_s15 }
 0x1d9   :  { %801 = vrot.lane.b32.xlu1 %v1613_v26, %s1252_s15 }
 0x1dd   :  { %805 = vrot.lane.b32.xlu1 %v1620_v28, %s1252_s15  ;;  %s978_s15 = sshll.u32 %s1254_s4, 4  ;;  %s979_s15 = int_to_ptr.vmem [resolvable:$true] %s978_s15 }
 0x1de   :  { %s1227_s7 = scalar_lea.vmem %s979_s15, 16  ;;  %s1231_s8 = scalar_lea.vmem %s979_s15, 32 }
 0x1df   :  { %p1228_p0 = scmp.ne.s32.totalorder %s979_s15, %s1227_s7  ;;  %p1232_p1 = scmp.lt.s32.totalorder %s979_s15, %s979_s15 }
 0x1e0   :  { %p1233_p2 = scmp.lt.s32.totalorder %s1231_s8, %s1227_s7 }
 0x1e2   :  { %p1234_p3 = por %p1233_p2, %p1232_p1 }
 0x1e4   :  { %p1235_p4 = pnand %p1234_p3, %p1228_p0 }
 0x226   :  { %v665_v9 = vpop.permute.xlu1 %664 }
 0x227   :  { %v698_v36 = vmul.f32 %v665_v9, %v1431_v61 }
 0x228   :  { %v660_v31 = vpop.permute.xlu0 %659 }
 0x229   :  { %v697_v32 = vmul.f32 %v660_v31, %v1429_v59 }
 0x22c   :  { %v708_v33 = vpop.permute.xlu1 %707 }
 0x22d   :  { %v745_v35 = vadd.f32 %v708_v33, %v697_v32 }
 0x22f   :  { %v761_v39 = vmul.f32 0.2, %v745_v35  ;;  %vm753_vm15 = vcmp.ge.f32.partialorder %v745_v35, 0.0 }
 0x230   :  { %v713_v40 = vpop.permute.xlu1 %712 }
 0x231   :  { %v746_v41 = vadd.f32 %v713_v40, %v698_v36  ;;  %v769_v43 = vsel %vm753_vm15, %v745_v35, %v761_v39 }
 0x232   :  { %v826_v48 = vmul.f32 %v818_v46, %v769_v43 }
 0x233   :  { %vm754_vm2 = vcmp.ge.f32.partialorder %v746_v41, 0.0  ;;  %v762_v44 = vmul.f32 0.2, %v746_v41 }
 0x234   :  { %v670_v45 = vpop.permute.xlu1 %669 }
 0x235   :  { %v770_v59 = vsel %vm754_vm2, %v746_v41, %v762_v44  ;;  %v699_v60 = vmul.f32 %v670_v45, %v1442_v14 }
 0x236   :  { %v827_v49 = vmul.f32 %v819_v47, %v770_v59 }
 0x238   :  { %v675_v50 = vpop.permute.xlu1 %674  ;;  %v685_v61 = vpop.permute.xlu0 %684  ;;  %v834_v18 = vpack.c.bf16 %v827_v49, %v826_v48 }
 0x239   :  { %v700_v3 = vmul.f32 %v675_v50, %v1444_v16  ;;  %v702_v1 = vmul.f32 %v685_v61, %v1459_v37 }
 0x23a   :  { %1133 = vmatprep.mubr.msk.bf16.mxu0 %vm512_vm0, %v834_v18 }
 0x23c   :  { %v718_v51 = vpop.permute.xlu1 %717  ;;  %v733_v52 = vpop.permute.xlu0 %732 }
 0x23d   :  { %v747_v27 = vadd.f32 %v718_v51, %v699_v60  ;;  %v750_v11 = vadd.f32 %v733_v52, %v702_v1 }
 0x23f   :  { %v763_v10 = vmul.f32 0.2, %v747_v27  ;;  %vm755_vm4 = vcmp.ge.f32.partialorder %v747_v27, 0.0  ;;  %vm758_vm5 = vcmp.ge.f32.partialorder %v750_v11, 0.0  ;;  %v766_v37 = vmul.f32 0.2, %v750_v11 }
 0x240   :  { %v723_v53 = vpop.permute.xlu1 %722  ;;  %v695_v55 = vpop.permute.xlu0 %694 }
 0x241   :  { %v748_v4 = vadd.f32 %v723_v53, %v700_v3  ;;  %v704_v16 = vmul.f32 %v695_v55, %v1473_v57  ;;  %v771_v17 = vsel %vm755_vm4, %v747_v27, %v763_v10  ;;  %v774_v29 = vsel %vm758_vm5, %v750_v11, %v766_v37 }
 0x243   :  { %v764_v2 = vmul.f32 0.2, %v748_v4  ;;  %vm756_vm3 = vcmp.ge.f32.partialorder %v748_v4, 0.0 }
 0x244   :  { %v680_v56 = vpop.permute.xlu1 %679  ;;  %v800_v42 = vpop.permute.xlu0 %799 }
 0x245   :  { %v701_v7 = vmul.f32 %v680_v56, %v1456_v34  ;;  %v772_v6 = vsel %vm756_vm3, %v748_v4, %v764_v2  ;;  %v821_v14 = vsel %vm817_vm1, %v1570_v5, %v800_v42 }
 0x246   :  { %v829_v8 = vmul.f32 %v821_v14, %v772_v6 }
 0x248   :  { %v728_v58 = vpop.permute.xlu1 %727  ;;  %v743_v62 = vpop.permute.xlu0 %742 }
 0x249   :  { %v749_v13 = vadd.f32 %v728_v58, %v701_v7  ;;  %v752_v21 = vadd.f32 %v743_v62, %v704_v16 }
 0x24b   :  { %v765_v34 = vmul.f32 0.2, %v749_v13  ;;  %vm757_vm6 = vcmp.ge.f32.partialorder %v749_v13, 0.0  ;;  %v768_v9 = vmul.f32 0.2, %v752_v21  ;;  %vm760_vm7 = vcmp.ge.f32.partialorder %v752_v21, 0.0 }
 0x24c   :  { %v690_v0 = vpop.permute.xlu1 %689  ;;  %v804_v15 = vpop.permute.xlu0 %803 }
 0x24d   :  { %v703_v38 = vmul.f32 %v690_v0, %v1470_v54  ;;  %v823_v57 = vsel %vm817_vm1, %v1588_v20, %v804_v15  ;;  %v773_v32 = vsel %vm757_vm6, %v749_v13, %v765_v34  ;;  %v776_v40 = vsel %vm760_vm7, %v752_v21, %v768_v9 }
 0x24e   :  { %v831_v35 = vmul.f32 %v823_v57, %v774_v29 }
 0x250   :  { %v738_v12 = vpop.permute.xlu1 %737  ;;  %v808_v5 = vpop.permute.xlu0 %807 }
 0x251   :  { %v751_v22 = vadd.f32 %v738_v12, %v703_v38  ;;  %v825_v36 = vsel %vm817_vm1, %v1599_v24, %v808_v5 }
 0x252   :  { %v833_v44 = vmul.f32 %v825_v36, %v776_v40 }
 0x253   :  { %v767_v31 = vmul.f32 0.2, %v751_v22  ;;  %vm759_vm8 = vcmp.ge.f32.partialorder %v751_v22, 0.0 }
 0x254   :  { %v798_v19 = vpop.permute.xlu1 %797 }
 0x255   :  { %v820_v23 = vsel %vm817_vm1, %v1606_v25, %v798_v19  ;;  %v775_v41 = vsel %vm759_vm8, %v751_v22, %v767_v31 }
 0x256   :  { %v828_v63 = vmul.f32 %v820_v23, %v771_v17 }
 0x258   :  { %v835_v30 = vpack.c.bf16 %v829_v8, %v828_v63  ;;  %v802_v54 = vpop.permute.xlu1 %801 }
 0x259   :  { %v822_v33 = vsel %vm817_vm1, %v1613_v26, %v802_v54 }
 0x25a   :  { %v830_v25 = vmul.f32 %v822_v33, %v773_v32  ;;  %1134 = vmatmul.mubr.msk.bf16.vlgmr.msra.gmra.mrb[16].mxu0 %vm512_vm0, %v835_v30 }
 0x25c   :  { %v836_v20 = vpack.c.bf16 %v831_v35, %v830_v25  ;;  %v806_v39 = vpop.permute.xlu1 %805 }
 0x25d   :  { %v824_v43 = vsel %vm817_vm1, %v1620_v28, %v806_v39 }
 0x25e   :  { %v832_v45 = vmul.f32 %v824_v43, %v775_v41  ;;  %1137 = vmatprep.mubr.msk.bf16.mxu1 %vm512_vm0, %v836_v20 }
 0x260   :  { %v837_v26 = vpack.c.bf16 %v833_v44, %v832_v45 }
 0x262   :  { %1138 = vmatmul.mubr.msk.bf16.vlgmr.msra.gmra.mrb[16].mxu1 %vm512_vm0, %v837_v26  ;;  %vm970_vm0 = vcmask 8192  }
 0x32d   :  { %v1135_v46 = vpop.f32.mrb[16].mxu0 }
 0x32e   :  { %v911_v47 = vpop.f32.mrb[17].mxu0  ;;  %v946_v61 = vsel %vm942_vm9, %v1135_v46, 0.0 }
 0x32f   :  { %v1136_v59 = vpop.f32.mrb[18].mxu0  ;;  %v943_v24 = vsel %vm942_vm9, %v911_v47, 0.0 }
 0x330   :  { %v914_v48 = vpop.f32.mrb[19].mxu0  ;;  %v948_v18 = vsel %vm942_vm9, %v1136_v59, 0.0 }
 0x331   :  { %v944_v49 = vsel %vm942_vm9, %v914_v48, 0.0 }
 0x332   :  { %v945_v50 = vadd.f32 %v944_v49, %v943_v24 }
 0x334   :  { %v947_v28 = vadd.f32 %v946_v61, %v945_v50 }
 0x335   :  { %v1139_v51 = vpop.f32.mrb[16].mxu1 }
 0x336   :  { %v927_v52 = vpop.f32.mrb[17].mxu1  ;;  %v949_v53 = vadd.f32 %v948_v18, %v947_v28  ;;  %v954_v4 = vsel %vm942_vm9, %v1139_v51, 0.0 }
 0x337   :  { %v950_v55 = vsel %vm942_vm9, %v927_v52, 0.0  ;;  %v1140_v56 = vpop.f32.mrb[18].mxu1 }
 0x338   :  { %v951_v42 = vadd.f32 %v950_v55, %v949_v53  ;;  %v930_v58 = vpop.f32.mrb[19].mxu1  ;;  %v956_v62 = vsel %vm942_vm9, %v1140_v56, 0.0 }
 0x339   :  { %v952_v3 = vsel %vm942_vm9, %v930_v58, 0.0 }
 0x33a   :  { %v953_v60 = vadd.f32 %v952_v3, %v951_v42 }
 0x33c   :  { %v955_v27 = vadd.f32 %v954_v4, %v953_v60 }
 0x33e   :  { %v957_v0 = vadd.f32 %v956_v62, %v955_v27 }
 0x340   :  { %v958_v1 = vrot.slane %v957_v0, 4 }
 0x342   :  { %v959_v2 = vadd.f32 %v958_v1, %v957_v0 }
 0x344   :  { %v960_v7 = vrot.slane %v959_v2, 2 }
 0x346   :  { %v961_v10 = vadd.f32 %v960_v7, %v959_v2 }
 0x348   :  { %v962_v11 = vrot.slane %v961_v10, 1 }
 0x34a   :  { %v963_v12 = vadd.f32 %v962_v11, %v961_v10 }
 0x34c   :  { %v1042_v13 = vmul.f32 -1.442695, %v963_v12 }
 0x34e   :  { %1223 = vpow2.f32 %v1042_v13 }
 0x358   :  { %v1224_v15 = vpop.eup %1223 }
 0x359   :  { %v967_v16 = vadd.f32 1.0, %v1224_v15 }
 0x35b   :  { %1225 = vrcp.f32 %v967_v16 }
 0x365   :  { %v1226_v6 = vpop.eup %1225 }
 0x366   :  { %971 = vst.msk [vmem:[#allocation2] sm:$0x1] %vm970_vm0, %v1226_v6 }
 0x367   :  { %1238 = shalt.err (!%p1235_p4)
}
 0x368   :  { %s1239_s11 = scalar_lea.hbm %s1677_s5, 16 }
 0x369   :  { %p1240_p5 = scmp.ne.s32.totalorder %s1677_s5, %s1239_s11  ;;  %p1243_p6 = scmp.lt.u32.totalorder %s1239_s11, %s1677_s5 }
 0x36b   :  { %p1245_p7 = pnand %p1243_p6, %p1240_p5 }
 0x36d   :  { %1248 = shalt.err (!%p1245_p7)
}
 0x36e   :  { %981 = dma.vmem_to_hbm [thread:$0]  %s979_s15, 16, %s1677_s5, [#allocation3]  }
 0x36f   :  { %1249 = dma.done.wait [#allocation3], 16  }
 0x370   :  { %1250 = vsyncadd [#allocation3], 4294967280 }
 0x371   :  { %985 = vsyncpa [#allocation3], 1 }

</bundles_post_ra>
